<compile_context>
chip_gen: v7x
topology: tpu7x:2x2x1
jax: 0.10.0
libtpu: 0.0.40
codegen_flags: <defaults>
</compile_context>

<pallas_src>
import jax
import jax.numpy as jnp
from jax import lax
from jax.experimental import pallas as pl
from jax.experimental.pallas import tpu as pltpu

# ----- small, deterministic hyper-parameters ---------------------------------
VOCAB = 100
D_ROBERTA = 768          # roberta-base hidden size
HIDDEN = 32              # hidden_units
N_TAGS = 3
TAG_PAD = 128            # fc output padded to one full lane width
B = 2
S = 8
DROPOUT_RATE = 0.1       # inference mode -> identity
SMALL_ROWS = 72          # 8-row-aligned packing of the small f32 operands


# ============================ fused Pallas kernel ============================

def fused_forward(x_col_flat, prm, bsz, slen):
    """x_col_flat: (B*S, 3*Cin) bf16 im2col'd conv input -> (B, S, N_TAGS)."""
    kdim = x_col_flat.shape[1]
    gwidth = 8 * HIDDEN                       # combined gate width, both dirs

    def kernel(xcol_ref, wfused_ref, small_ref, o_ref):
        hid2 = gwidth // 4                    # 2H = 64   (concat [fwd|bwd] state)
        hid = hid2 // 2                       # H  = 32

        # -- unpack the single small-operand slab (all slices 8/128 aligned) --
        b_fused = small_ref[0:1, 0:gwidth]                          # (1, 8H)
        w_hh = small_ref[8:8 + hid2, 0:gwidth]                      # (2H, 8H) blockdiag
        b_fc = small_ref[0:1, gwidth:gwidth + TAG_PAD]              # (1, 128)
        w_fc = small_ref[8:8 + hid2, gwidth:gwidth + TAG_PAD]       # (2H, 128)

        # -- fused Conv1d + LSTM input projection: one bf16 MXU pass, M=B*S ---
        gx = (jnp.dot(xcol_ref[...], wfused_ref[...],
                      preferred_element_type=jnp.float32)
              + b_fused)                                            # (B*S, 8H) f32
        gx = gx.reshape(bsz, slen, gwidth)

        # column masks: gate layout is [i_f|i_b | f_f|f_b | g_f|g_b | o_f|o_b]
        col_g = lax.broadcasted_iota(jnp.int32, (1, gwidth), 1)
        fwd_gate = (col_g % hid2) < hid                             # (1, 8H)
        col_h = lax.broadcasted_iota(jnp.int32, (1, hid2), 1)
        fwd_half = col_h < hid                                      # (1, 2H)

        # -- BiLSTM recurrence: one (B,2H)@(2H,8H) matmul per step ------------
        h = jnp.zeros((bsz, hid2), jnp.float32)                     # [h_f | h_b]
        c = jnp.zeros((bsz, hid2), jnp.float32)
        hs = []
        for t in range(slen):                 # S fixed & small -> static unroll
            tr = slen - 1 - t
            # forward columns read time t, backward columns read time S-1-t
            gin = jnp.where(fwd_gate, gx[:, t, :], gx[:, tr, :])    # (B, 8H)
            g = gin + jnp.dot(h, w_hh, preferred_element_type=jnp.float32)
            sig = jax.nn.sigmoid(g)           # one EUP push over full width
            i_g = sig[:, 0:hid2]
            f_g = sig[:, hid2:2 * hid2]
            gg = jnp.tanh(g[:, 2 * hid2:3 * hid2])
            o_g = sig[:, 3 * hid2:4 * hid2]
            c = f_g * c + i_g * gg
            h = o_g * jnp.tanh(c)
            hs.append(h)

        # lstm_out[b,t] = [h_f(t) | h_b(t)]; backward states were produced in
        # reverse time order, so select per column half (VPU select).
        rows = [jnp.where(fwd_half, hs[t], hs[slen - 1 - t]) for t in range(slen)]
        lstm_out = jnp.stack(rows, axis=1).reshape(bsz * slen, hid2)  # (B*S, 2H)

        # Dropout: identity at inference time (eval mode).
        # -- fc emission projection; padded N=128 -> one lane-dense store -----
        emis = (jnp.dot(lstm_out, w_fc, preferred_element_type=jnp.float32)
                + b_fc)                                             # (B*S, 128)
        o_ref[...] = emis.astype(o_ref.dtype)

    out = pl.pallas_call(
        kernel,
        out_shape=jax.ShapeDtypeStruct((bsz * slen, TAG_PAD), jnp.float32),
        grid=(1,),
        in_specs=[
            pl.BlockSpec((bsz * slen, kdim), lambda i: (0, 0)),
            pl.BlockSpec((kdim, gwidth), lambda i: (0, 0)),
            pl.BlockSpec((SMALL_ROWS, gwidth + TAG_PAD), lambda i: (0, 0)),
        ],
        out_specs=pl.BlockSpec((bsz * slen, TAG_PAD), lambda i: (0, 0)),
        compiler_params=pltpu.CompilerParams(
            dimension_semantics=("arbitrary",)),
    )(x_col_flat, prm["w_fused"], prm["small"])
    return out.reshape(bsz, slen, TAG_PAD)[:, :, :N_TAGS]


# ============================ plain-JAX glue =================================

def crf_decode(emissions, mask, start, end, trans):
    """torchcrf-style Viterbi decode (batch_first).  Tiny tag space (3) ->
    plain JAX.  Returns (B, S) int32 tags; padded positions repeat the last
    valid tag."""
    bsz, slen, ntag = emissions.shape
    mask = mask.astype(bool)
    score = start[None, :] + emissions[:, 0]                        # (B, T)

    def fwd(score, inp):
        em_t, m_t = inp                                             # (B,T),(B,)
        nxt = score[:, :, None] + trans[None] + em_t[:, None, :]    # (B, T, T)
        idx = jnp.argmax(nxt, axis=1)                               # (B, T)
        nxt = jnp.max(nxt, axis=1)
        return jnp.where(m_t[:, None], nxt, score), idx

    score, history = lax.scan(
        fwd, score,
        (jnp.transpose(emissions[:, 1:], (1, 0, 2)), mask[:, 1:].T))
    score = score + end[None, :]
    best_last = jnp.argmax(score, axis=1)                           # (B,)

    def bwd(cur, inp):
        hist_t, m_t = inp                                           # (B,T),(B,)
        prev = jnp.take_along_axis(hist_t, cur[:, None], axis=1)[:, 0]
        return jnp.where(m_t, prev, cur), cur

    tag0, tags_rev = lax.scan(bwd, best_last,
                              (history[::-1], mask[:, 1:].T[::-1]))
    tags = jnp.concatenate([tag0[None], tags_rev[::-1]], axis=0).T
    return tags.astype(jnp.int32)


def init_params(key):
    """Torch-layout parameters (as nn.Module would hold them)."""
    ks = jax.random.split(key, 16)
    u = lambda k, shape, s: jax.random.uniform(k, shape, jnp.float32, -s, s)
    p = {
        # TODO(synk): RobertaModel.from_pretrained('roberta-base') has no Pallas
        # equivalent without the checkpoint; replaced by a deterministic token
        # embedding producing 768-dim hidden states.
        "emb": jax.random.normal(ks[0], (VOCAB, D_ROBERTA), jnp.float32) * 0.02,
        "conv_w": u(ks[1], (HIDDEN, D_ROBERTA, 3), (D_ROBERTA * 3) ** -0.5),
        "conv_b": u(ks[2], (HIDDEN,), (D_ROBERTA * 3) ** -0.5),
        "w_ih_f": u(ks[3], (4 * HIDDEN, HIDDEN), HIDDEN ** -0.5),
        "w_hh_f": u(ks[4], (4 * HIDDEN, HIDDEN), HIDDEN ** -0.5),
        "b_ih_f": u(ks[5], (4 * HIDDEN,), HIDDEN ** -0.5),
        "b_hh_f": u(ks[6], (4 * HIDDEN,), HIDDEN ** -0.5),
        "w_ih_b": u(ks[7], (4 * HIDDEN, HIDDEN), HIDDEN ** -0.5),
        "w_hh_b": u(ks[8], (4 * HIDDEN, HIDDEN), HIDDEN ** -0.5),
        "b_ih_b": u(ks[9], (4 * HIDDEN,), HIDDEN ** -0.5),
        "b_hh_b": u(ks[10], (4 * HIDDEN,), HIDDEN ** -0.5),
        "fc_w": u(ks[11], (N_TAGS, 2 * HIDDEN), (2 * HIDDEN) ** -0.5),
        "fc_b": u(ks[12], (N_TAGS,), (2 * HIDDEN) ** -0.5),
        "crf_start": u(ks[13], (N_TAGS,), 0.1),
        "crf_end": u(ks[14], (N_TAGS,), 0.1),
        "crf_trans": u(ks[15], (N_TAGS, N_TAGS), 0.1),
    }
    return p


def prepare_params(p):
    """One-time weight preprocessing (fusion / reordering / padding / packing),
    hoisted out of the per-forward path."""
    h = HIDDEN
    g = 8 * h                                        # 256: both dirs, 4 gates

    # Conv weight in im2col layout: rows tap-major then cin -> (3*Cin, H).
    w_conv_col = jnp.transpose(p["conv_w"], (2, 1, 0)).reshape(3 * D_ROBERTA, h)

    def gate_blocks(w):                              # w: torch (4H, H), rows [i|f|g|o]
        wt = w.T                                     # (H, 4H)
        return [wt[:, k * h:(k + 1) * h] for k in range(4)]

    # Gate-major / direction-minor column order: [i_f|i_b|f_f|f_b|g_f|g_b|o_f|o_b].
    ih_f, ih_b = gate_blocks(p["w_ih_f"]), gate_blocks(p["w_ih_b"])
    w_ih_go = jnp.concatenate(
        [blk for k in range(4) for blk in (ih_f[k], ih_b[k])], axis=1)    # (H, 8H)

    bf = p["b_ih_f"] + p["b_hh_f"]
    bb = p["b_ih_b"] + p["b_hh_b"]
    b_go = jnp.concatenate(
        [blk for k in range(4) for blk in (bf[k * h:(k + 1) * h],
                                           bb[k * h:(k + 1) * h])])       # (8H,)

    # Fuse Conv1d into the LSTM input projection (no nonlinearity in between):
    #   gx = x_col @ (W_conv @ W_ih) + (b_conv @ W_ih + b_ih+b_hh)
    w_fused = (w_conv_col @ w_ih_go).astype(jnp.bfloat16)                 # (2304, 8H)
    b_fused = p["conv_b"] @ w_ih_go + b_go                                # (8H,)

    # Block-diagonal recurrence weight: h=[h_f|h_b] (2H) -> all gates (8H).
    hh_f, hh_b = gate_blocks(p["w_hh_f"]), gate_blocks(p["w_hh_b"])
    z = jnp.zeros((h, h), jnp.float32)
    cols = []
    for k in range(4):
        cols.append(jnp.concatenate([hh_f[k], z], axis=0))
        cols.append(jnp.concatenate([z, hh_b[k]], axis=0))
    w_hh_blk = jnp.concatenate(cols, axis=1)                              # (2H, 8H)

    # fc weight/bias padded to one full 128-lane block.
    w_fc_pad = jnp.zeros((2 * h, TAG_PAD), jnp.float32).at[:, :N_TAGS].set(p["fc_w"].T)
    b_fc_pad = jnp.zeros((TAG_PAD,), jnp.float32).at[:N_TAGS].set(p["fc_b"])

    # Single packed slab for all small f32 operands -> one DMA instead of four.
    small = jnp.zeros((SMALL_ROWS, g + TAG_PAD), jnp.float32)
    small = small.at[0, 0:g].set(b_fused)
    small = small.at[8:8 + 2 * h, 0:g].set(w_hh_blk)
    small = small.at[0, g:g + TAG_PAD].set(b_fc_pad)
    small = small.at[8:8 + 2 * h, g:g + TAG_PAD].set(w_fc_pad)

    return {
        "emb": p["emb"],
        "w_fused": w_fused,                          # (2304, 256) bf16
        "small": small,                              # (72, 384)  f32
        "crf_start": p["crf_start"],
        "crf_end": p["crf_end"],
        "crf_trans": p["crf_trans"],
    }


@jax.jit
def sentiment_forward(params, input_ids, attention_mask):
    # "roberta" stub: deterministic embedding lookup -> (B, S, 768)
    seq = params["emb"][input_ids]
    bsz, slen = input_ids.shape
    # im2col for Conv1d(k=3, pad=1): concat the three taps along K so the
    # kernel does a single (B*S, 2304) @ (2304, 256) bf16 matmul.
    xp = jnp.pad(seq, ((0, 0), (1, 1), (0, 0)))
    x_col = jnp.concatenate(
        [xp[:, 0:slen], xp[:, 1:slen + 1], xp[:, 2:slen + 2]], axis=-1)
    x_col = x_col.reshape(bsz * slen, 3 * D_ROBERTA).astype(jnp.bfloat16)
    # Fused Conv1d + BiLSTM + (Dropout=identity) + fc in one pallas_call.
    emissions = fused_forward(x_col, params, bsz, slen)
    # labels is None branch: CRF Viterbi decode (plain JAX, 3 tags).
    tags = crf_decode(emissions, attention_mask, params["crf_start"],
                      params["crf_end"], params["crf_trans"])
    return emissions, tags


if __name__ == "__main__":
    key = jax.random.PRNGKey(0)
    pkey, dkey = jax.random.split(key)
    params = prepare_params(init_params(pkey))

    input_ids = jax.random.randint(dkey, (B, S), 0, VOCAB, dtype=jnp.int32)
    attention_mask = jnp.ones((B, S), dtype=jnp.int32)

    emissions, tags = sentiment_forward(params, input_ids, attention_mask)
    jax.block_until_ready((emissions, tags))

    assert emissions.shape == (B, S, N_TAGS)
    assert tags.shape == (B, S)
    assert bool(jnp.all(jnp.isfinite(emissions)))
    assert bool(jnp.all((tags >= 0) & (tags < N_TAGS)))
    print("KERNEL_OK")
</pallas_src>

<mosaic_0001>
module attributes {stable_mosaic.version = 11 : i64} {
  func.func @kernel(%arg0: i32, %arg1: memref<16x2304xbf16, #tpu.memory_space<vmem>>, %arg2: memref<2304x256xbf16, #tpu.memory_space<vmem>>, %arg3: memref<72x384xf32, #tpu.memory_space<vmem>>, %arg4: memref<16x128xf32, #tpu.memory_space<vmem>>) attributes {dimension_semantics = [#tpu.dimension_semantics<arbitrary>], iteration_bounds = array<i64: 1>, scalar_prefetch = 0 : i64, scratch_operands = 0 : i64, tpu.core_type = #tpu.core_type<tc>, window_params = [{pipeline_mode = #tpu.pipeline_mode<synchronous>, transform_indices = @transform_0, window_bounds = array<i64: 16, 2304>}, {pipeline_mode = #tpu.pipeline_mode<synchronous>, transform_indices = @transform_1, window_bounds = array<i64: 2304, 256>}, {pipeline_mode = #tpu.pipeline_mode<synchronous>, transform_indices = @transform_2, window_bounds = array<i64: 72, 384>}, {pipeline_mode = #tpu.pipeline_mode<synchronous>, transform_indices = @transform_3, window_bounds = array<i64: 16, 128>}]} {
    %c0 = arith.constant 0 : index
    %c0_0 = arith.constant 0 : index
    %0 = vector.load %arg3[%c0, %c0_0] : memref<72x384xf32, #tpu.memory_space<vmem>>, vector<1x256xf32>
    %c8 = arith.constant 8 : index
    %c0_1 = arith.constant 0 : index
    %1 = vector.load %arg3[%c8, %c0_1] : memref<72x384xf32, #tpu.memory_space<vmem>>, vector<64x256xf32>
    %c0_2 = arith.constant 0 : index
    %c256 = arith.constant 256 : index
    %2 = vector.load %arg3[%c0_2, %c256] : memref<72x384xf32, #tpu.memory_space<vmem>>, vector<1x128xf32>
    %c8_3 = arith.constant 8 : index
    %c256_4 = arith.constant 256 : index
    %3 = vector.load %arg3[%c8_3, %c256_4] : memref<72x384xf32, #tpu.memory_space<vmem>>, vector<64x128xf32>
    %c0_5 = arith.constant 0 : index
    %c0_6 = arith.constant 0 : index
    %4 = vector.load %arg1[%c0_5, %c0_6] : memref<16x2304xbf16, #tpu.memory_space<vmem>>, vector<16x2304xbf16>
    %c0_7 = arith.constant 0 : index
    %c0_8 = arith.constant 0 : index
    %5 = vector.load %arg2[%c0_7, %c0_8] : memref<2304x256xbf16, #tpu.memory_space<vmem>>, vector<2304x256xbf16>
    %cst = arith.constant dense<0.000000e+00> : vector<16x256xf32>
    %6 = tpu.matmul %4, %5, %cst {dimension_numbers = #tpu.dot_dimension_numbers<[1], [0], [0], [1], [0, 0, 1, 1], [], []>} : vector<16x2304xbf16>, vector<2304x256xbf16>, vector<16x256xf32> -> vector<16x256xf32>
    %7 = vector.broadcast %0 : vector<1x256xf32> to vector<16x256xf32>
    %8 = arith.addf %6, %7 : vector<16x256xf32>
    %9 = vector.shape_cast %8 : vector<16x256xf32> to vector<2x8x256xf32>
    %10 = tpu.iota {dimensions = array<i32: 1>} : vector<1x256xi32>
    %c64_i32 = arith.constant 64 : i32
    %c0_i32 = arith.constant 0 : i32
    %11 = arith.cmpi eq, %c64_i32, %c0_i32 : i32
    %c1_i32 = arith.constant 1 : i32
    %12 = arith.select %11, %c1_i32, %c64_i32 : i32
    %13 = vector.broadcast %12 : i32 to vector<1x256xi32>
    %14 = arith.remsi %10, %13 : vector<1x256xi32>
    %c0_i32_9 = arith.constant 0 : i32
    %15 = vector.broadcast %c0_i32_9 : i32 to vector<1x256xi32>
    %16 = arith.cmpi ne, %14, %15 : vector<1x256xi32>
    %c0_i32_10 = arith.constant 0 : i32
    %17 = vector.broadcast %c0_i32_10 : i32 to vector<1x256xi32>
    %18 = arith.cmpi slt, %14, %17 : vector<1x256xi32>
    %c0_i32_11 = arith.constant 0 : i32
    %19 = arith.cmpi slt, %12, %c0_i32_11 : i32
    %20 = vector.broadcast %19 : i1 to vector<1x256xi1>
    %21 = vector.broadcast %20 : vector<1x256xi1> to vector<1x256xi1>
    %22 = arith.xori %18, %21 : vector<1x256xi1>
    %23 = arith.andi %22, %16 : vector<1x256xi1>
    %24 = vector.broadcast %12 : i32 to vector<1x256xi32>
    %25 = arith.addi %14, %24 : vector<1x256xi32>
    %26 = arith.select %23, %25, %14 : vector<1x256xi1>, vector<1x256xi32>
    %c32_i32 = arith.constant 32 : i32
    %27 = vector.broadcast %c32_i32 : i32 to vector<1x256xi32>
    %28 = arith.cmpi slt, %26, %27 : vector<1x256xi32>
    %29 = tpu.iota {dimensions = array<i32: 1>} : vector<1x64xi32>
    %c32_i32_12 = arith.constant 32 : i32
    %30 = vector.broadcast %c32_i32_12 : i32 to vector<1x64xi32>
    %31 = arith.cmpi slt, %29, %30 : vector<1x64xi32>
    %cst_13 = arith.constant 0.000000e+00 : f32
    %32 = vector.broadcast %cst_13 : f32 to vector<2x64xf32>
    %cst_14 = arith.constant 0.000000e+00 : f32
    %33 = vector.broadcast %cst_14 : f32 to vector<2x64xf32>
    %34 = vector.extract_strided_slice %9 {offsets = [0, 0, 0], sizes = [2, 1, 256], strides = [1, 1, 1]} : vector<2x8x256xf32> to vector<2x1x256xf32>
    %35 = vector.shape_cast %34 : vector<2x1x256xf32> to vector<2x256xf32>
    %36 = vector.extract_strided_slice %9 {offsets = [0, 7, 0], sizes = [2, 1, 256], strides = [1, 1, 1]} : vector<2x8x256xf32> to vector<2x1x256xf32>
    %37 = vector.shape_cast %36 : vector<2x1x256xf32> to vector<2x256xf32>
    %38 = vector.shape_cast %28 : vector<1x256xi1> to vector<1x256xi1>
    %39 = vector.broadcast %38 : vector<1x256xi1> to vector<2x256xi1>
    %40 = arith.select %39, %35, %37 : vector<2x256xi1>, vector<2x256xf32>
    %cst_15 = arith.constant dense<0.000000e+00> : vector<2x256xf32>
    %41 = tpu.matmul %32, %1, %cst_15 {dimension_numbers = #tpu.dot_dimension_numbers<[1], [0], [0], [1], [0, 0, 1, 1], [], []>} : vector<2x64xf32>, vector<64x256xf32>, vector<2x256xf32> -> vector<2x256xf32>
    %42 = arith.addf %40, %41 : vector<2x256xf32>
    %43 = arith.negf %42 : vector<2x256xf32>
    %44 = math.exp %43 : vector<2x256xf32>
    %cst_16 = arith.constant 1.000000e+00 : f32
    %45 = vector.broadcast %cst_16 : f32 to vector<2x256xf32>
    %46 = arith.addf %45, %44 : vector<2x256xf32>
    %47 = arith.divf %45, %46 : vector<2x256xf32>
    %48 = vector.extract_strided_slice %47 {offsets = [0, 0], sizes = [2, 64], strides = [1, 1]} : vector<2x256xf32> to vector<2x64xf32>
    %49 = vector.extract_strided_slice %47 {offsets = [0, 64], sizes = [2, 64], strides = [1, 1]} : vector<2x256xf32> to vector<2x64xf32>
    %50 = vector.extract_strided_slice %42 {offsets = [0, 128], sizes = [2, 64], strides = [1, 1]} : vector<2x256xf32> to vector<2x64xf32>
    %51 = math.tanh %50 : vector<2x64xf32>
    %52 = vector.extract_strided_slice %47 {offsets = [0, 192], sizes = [2, 64], strides = [1, 1]} : vector<2x256xf32> to vector<2x64xf32>
    %53 = arith.mulf %49, %33 : vector<2x64xf32>
    %54 = arith.mulf %48, %51 : vector<2x64xf32>
    %55 = arith.addf %53, %54 : vector<2x64xf32>
    %56 = math.tanh %55 : vector<2x64xf32>
    %57 = arith.mulf %52, %56 : vector<2x64xf32>
    %58 = vector.extract_strided_slice %9 {offsets = [0, 1, 0], sizes = [2, 1, 256], strides = [1, 1, 1]} : vector<2x8x256xf32> to vector<2x1x256xf32>
    %59 = vector.shape_cast %58 : vector<2x1x256xf32> to vector<2x256xf32>
    %60 = vector.extract_strided_slice %9 {offsets = [0, 6, 0], sizes = [2, 1, 256], strides = [1, 1, 1]} : vector<2x8x256xf32> to vector<2x1x256xf32>
    %61 = vector.shape_cast %60 : vector<2x1x256xf32> to vector<2x256xf32>
    %62 = vector.shape_cast %28 : vector<1x256xi1> to vector<1x256xi1>
    %63 = vector.broadcast %62 : vector<1x256xi1> to vector<2x256xi1>
    %64 = arith.select %63, %59, %61 : vector<2x256xi1>, vector<2x256xf32>
    %cst_17 = arith.constant dense<0.000000e+00> : vector<2x256xf32>
    %65 = tpu.matmul %57, %1, %cst_17 {dimension_numbers = #tpu.dot_dimension_numbers<[1], [0], [0], [1], [0, 0, 1, 1], [], []>} : vector<2x64xf32>, vector<64x256xf32>, vector<2x256xf32> -> vector<2x256xf32>
    %66 = arith.addf %64, %65 : vector<2x256xf32>
    %67 = arith.negf %66 : vector<2x256xf32>
    %68 = math.exp %67 : vector<2x256xf32>
    %cst_18 = arith.constant 1.000000e+00 : f32
    %69 = vector.broadcast %cst_18 : f32 to vector<2x256xf32>
    %70 = arith.addf %69, %68 : vector<2x256xf32>
    %71 = arith.divf %69, %70 : vector<2x256xf32>
    %72 = vector.extract_strided_slice %71 {offsets = [0, 0], sizes = [2, 64], strides = [1, 1]} : vector<2x256xf32> to vector<2x64xf32>
    %73 = vector.extract_strided_slice %71 {offsets = [0, 64], sizes = [2, 64], strides = [1, 1]} : vector<2x256xf32> to vector<2x64xf32>
    %74 = vector.extract_strided_slice %66 {offsets = [0, 128], sizes = [2, 64], strides = [1, 1]} : vector<2x256xf32> to vector<2x64xf32>
    %75 = math.tanh %74 : vector<2x64xf32>
    %76 = vector.extract_strided_slice %71 {offsets = [0, 192], sizes = [2, 64], strides = [1, 1]} : vector<2x256xf32> to vector<2x64xf32>
    %77 = arith.mulf %73, %55 : vector<2x64xf32>
    %78 = arith.mulf %72, %75 : vector<2x64xf32>
    %79 = arith.addf %77, %78 : vector<2x64xf32>
    %80 = math.tanh %79 : vector<2x64xf32>
    %81 = arith.mulf %76, %80 : vector<2x64xf32>
    %82 = vector.extract_strided_slice %9 {offsets = [0, 2, 0], sizes = [2, 1, 256], strides = [1, 1, 1]} : vector<2x8x256xf32> to vector<2x1x256xf32>
    %83 = vector.shape_cast %82 : vector<2x1x256xf32> to vector<2x256xf32>
    %84 = vector.extract_strided_slice %9 {offsets = [0, 5, 0], sizes = [2, 1, 256], strides = [1, 1, 1]} : vector<2x8x256xf32> to vector<2x1x256xf32>
    %85 = vector.shape_cast %84 : vector<2x1x256xf32> to vector<2x256xf32>
    %86 = vector.shape_cast %28 : vector<1x256xi1> to vector<1x256xi1>
    %87 = vector.broadcast %86 : vector<1x256xi1> to vector<2x256xi1>
    %88 = arith.select %87, %83, %85 : vector<2x256xi1>, vector<2x256xf32>
    %cst_19 = arith.constant dense<0.000000e+00> : vector<2x256xf32>
    %89 = tpu.matmul %81, %1, %cst_19 {dimension_numbers = #tpu.dot_dimension_numbers<[1], [0], [0], [1], [0, 0, 1, 1], [], []>} : vector<2x64xf32>, vector<64x256xf32>, vector<2x256xf32> -> vector<2x256xf32>
    %90 = arith.addf %88, %89 : vector<2x256xf32>
    %91 = arith.negf %90 : vector<2x256xf32>
    %92 = math.exp %91 : vector<2x256xf32>
    %cst_20 = arith.constant 1.000000e+00 : f32
    %93 = vector.broadcast %cst_20 : f32 to vector<2x256xf32>
    %94 = arith.addf %93, %92 : vector<2x256xf32>
    %95 = arith.divf %93, %94 : vector<2x256xf32>
    %96 = vector.extract_strided_slice %95 {offsets = [0, 0], sizes = [2, 64], strides = [1, 1]} : vector<2x256xf32> to vector<2x64xf32>
    %97 = vector.extract_strided_slice %95 {offsets = [0, 64], sizes = [2, 64], strides = [1, 1]} : vector<2x256xf32> to vector<2x64xf32>
    %98 = vector.extract_strided_slice %90 {offsets = [0, 128], sizes = [2, 64], strides = [1, 1]} : vector<2x256xf32> to vector<2x64xf32>
    %99 = math.tanh %98 : vector<2x64xf32>
    %100 = vector.extract_strided_slice %95 {offsets = [0, 192], sizes = [2, 64], strides = [1, 1]} : vector<2x256xf32> to vector<2x64xf32>
    %101 = arith.mulf %97, %79 : vector<2x64xf32>
    %102 = arith.mulf %96, %99 : vector<2x64xf32>
    %103 = arith.addf %101, %102 : vector<2x64xf32>
    %104 = math.tanh %103 : vector<2x64xf32>
    %105 = arith.mulf %100, %104 : vector<2x64xf32>
    %106 = vector.extract_strided_slice %9 {offsets = [0, 3, 0], sizes = [2, 1, 256], strides = [1, 1, 1]} : vector<2x8x256xf32> to vector<2x1x256xf32>
    %107 = vector.shape_cast %106 : vector<2x1x256xf32> to vector<2x256xf32>
    %108 = vector.extract_strided_slice %9 {offsets = [0, 4, 0], sizes = [2, 1, 256], strides = [1, 1, 1]} : vector<2x8x256xf32> to vector<2x1x256xf32>
    %109 = vector.shape_cast %108 : vector<2x1x256xf32> to vector<2x256xf32>
    %110 = vector.shape_cast %28 : vector<1x256xi1> to vector<1x256xi1>
    %111 = vector.broadcast %110 : vector<1x256xi1> to vector<2x256xi1>
    %112 = arith.select %111, %107, %109 : vector<2x256xi1>, vector<2x256xf32>
    %cst_21 = arith.constant dense<0.000000e+00> : vector<2x256xf32>
    %113 = tpu.matmul %105, %1, %cst_21 {dimension_numbers = #tpu.dot_dimension_numbers<[1], [0], [0], [1], [0, 0, 1, 1], [], []>} : vector<2x64xf32>, vector<64x256xf32>, vector<2x256xf32> -> vector<2x256xf32>
    %114 = arith.addf %112, %113 : vector<2x256xf32>
    %115 = arith.negf %114 : vector<2x256xf32>
    %116 = math.exp %115 : vector<2x256xf32>
    %cst_22 = arith.constant 1.000000e+00 : f32
    %117 = vector.broadcast %cst_22 : f32 to vector<2x256xf32>
    %118 = arith.addf %117, %116 : vector<2x256xf32>
    %119 = arith.divf %117, %118 : vector<2x256xf32>
    %120 = vector.extract_strided_slice %119 {offsets = [0, 0], sizes = [2, 64], strides = [1, 1]} : vector<2x256xf32> to vector<2x64xf32>
    %121 = vector.extract_strided_slice %119 {offsets = [0, 64], sizes = [2, 64], strides = [1, 1]} : vector<2x256xf32> to vector<2x64xf32>
    %122 = vector.extract_strided_slice %114 {offsets = [0, 128], sizes = [2, 64], strides = [1, 1]} : vector<2x256xf32> to vector<2x64xf32>
    %123 = math.tanh %122 : vector<2x64xf32>
    %124 = vector.extract_strided_slice %119 {offsets = [0, 192], sizes = [2, 64], strides = [1, 1]} : vector<2x256xf32> to vector<2x64xf32>
    %125 = arith.mulf %121, %103 : vector<2x64xf32>
    %126 = arith.mulf %120, %123 : vector<2x64xf32>
    %127 = arith.addf %125, %126 : vector<2x64xf32>
    %128 = math.tanh %127 : vector<2x64xf32>
    %129 = arith.mulf %124, %128 : vector<2x64xf32>
    %130 = vector.extract_strided_slice %9 {offsets = [0, 4, 0], sizes = [2, 1, 256], strides = [1, 1, 1]} : vector<2x8x256xf32> to vector<2x1x256xf32>
    %131 = vector.shape_cast %130 : vector<2x1x256xf32> to vector<2x256xf32>
    %132 = vector.extract_strided_slice %9 {offsets = [0, 3, 0], sizes = [2, 1, 256], strides = [1, 1, 1]} : vector<2x8x256xf32> to vector<2x1x256xf32>
    %133 = vector.shape_cast %132 : vector<2x1x256xf32> to vector<2x256xf32>
    %134 = vector.shape_cast %28 : vector<1x256xi1> to vector<1x256xi1>
    %135 = vector.broadcast %134 : vector<1x256xi1> to vector<2x256xi1>
    %136 = arith.select %135, %131, %133 : vector<2x256xi1>, vector<2x256xf32>
    %cst_23 = arith.constant dense<0.000000e+00> : vector<2x256xf32>
    %137 = tpu.matmul %129, %1, %cst_23 {dimension_numbers = #tpu.dot_dimension_numbers<[1], [0], [0], [1], [0, 0, 1, 1], [], []>} : vector<2x64xf32>, vector<64x256xf32>, vector<2x256xf32> -> vector<2x256xf32>
    %138 = arith.addf %136, %137 : vector<2x256xf32>
    %139 = arith.negf %138 : vector<2x256xf32>
    %140 = math.exp %139 : vector<2x256xf32>
    %cst_24 = arith.constant 1.000000e+00 : f32
    %141 = vector.broadcast %cst_24 : f32 to vector<2x256xf32>
    %142 = arith.addf %141, %140 : vector<2x256xf32>
    %143 = arith.divf %141, %142 : vector<2x256xf32>
    %144 = vector.extract_strided_slice %143 {offsets = [0, 0], sizes = [2, 64], strides = [1, 1]} : vector<2x256xf32> to vector<2x64xf32>
    %145 = vector.extract_strided_slice %143 {offsets = [0, 64], sizes = [2, 64], strides = [1, 1]} : vector<2x256xf32> to vector<2x64xf32>
    %146 = vector.extract_strided_slice %138 {offsets = [0, 128], sizes = [2, 64], strides = [1, 1]} : vector<2x256xf32> to vector<2x64xf32>
    %147 = math.tanh %146 : vector<2x64xf32>
    %148 = vector.extract_strided_slice %143 {offsets = [0, 192], sizes = [2, 64], strides = [1, 1]} : vector<2x256xf32> to vector<2x64xf32>
    %149 = arith.mulf %145, %127 : vector<2x64xf32>
    %150 = arith.mulf %144, %147 : vector<2x64xf32>
    %151 = arith.addf %149, %150 : vector<2x64xf32>
    %152 = math.tanh %151 : vector<2x64xf32>
    %153 = arith.mulf %148, %152 : vector<2x64xf32>
    %154 = vector.extract_strided_slice %9 {offsets = [0, 5, 0], sizes = [2, 1, 256], strides = [1, 1, 1]} : vector<2x8x256xf32> to vector<2x1x256xf32>
    %155 = vector.shape_cast %154 : vector<2x1x256xf32> to vector<2x256xf32>
    %156 = vector.extract_strided_slice %9 {offsets = [0, 2, 0], sizes = [2, 1, 256], strides = [1, 1, 1]} : vector<2x8x256xf32> to vector<2x1x256xf32>
    %157 = vector.shape_cast %156 : vector<2x1x256xf32> to vector<2x256xf32>
    %158 = vector.shape_cast %28 : vector<1x256xi1> to vector<1x256xi1>
    %159 = vector.broadcast %158 : vector<1x256xi1> to vector<2x256xi1>
    %160 = arith.select %159, %155, %157 : vector<2x256xi1>, vector<2x256xf32>
    %cst_25 = arith.constant dense<0.000000e+00> : vector<2x256xf32>
    %161 = tpu.matmul %153, %1, %cst_25 {dimension_numbers = #tpu.dot_dimension_numbers<[1], [0], [0], [1], [0, 0, 1, 1], [], []>} : vector<2x64xf32>, vector<64x256xf32>, vector<2x256xf32> -> vector<2x256xf32>
    %162 = arith.addf %160, %161 : vector<2x256xf32>
    %163 = arith.negf %162 : vector<2x256xf32>
    %164 = math.exp %163 : vector<2x256xf32>
    %cst_26 = arith.constant 1.000000e+00 : f32
    %165 = vector.broadcast %cst_26 : f32 to vector<2x256xf32>
    %166 = arith.addf %165, %164 : vector<2x256xf32>
    %167 = arith.divf %165, %166 : vector<2x256xf32>
    %168 = vector.extract_strided_slice %167 {offsets = [0, 0], sizes = [2, 64], strides = [1, 1]} : vector<2x256xf32> to vector<2x64xf32>
    %169 = vector.extract_strided_slice %167 {offsets = [0, 64], sizes = [2, 64], strides = [1, 1]} : vector<2x256xf32> to vector<2x64xf32>
    %170 = vector.extract_strided_slice %162 {offsets = [0, 128], sizes = [2, 64], strides = [1, 1]} : vector<2x256xf32> to vector<2x64xf32>
    %171 = math.tanh %170 : vector<2x64xf32>
    %172 = vector.extract_strided_slice %167 {offsets = [0, 192], sizes = [2, 64], strides = [1, 1]} : vector<2x256xf32> to vector<2x64xf32>
    %173 = arith.mulf %169, %151 : vector<2x64xf32>
    %174 = arith.mulf %168, %171 : vector<2x64xf32>
    %175 = arith.addf %173, %174 : vector<2x64xf32>
    %176 = math.tanh %175 : vector<2x64xf32>
    %177 = arith.mulf %172, %176 : vector<2x64xf32>
    %178 = vector.extract_strided_slice %9 {offsets = [0, 6, 0], sizes = [2, 1, 256], strides = [1, 1, 1]} : vector<2x8x256xf32> to vector<2x1x256xf32>
    %179 = vector.shape_cast %178 : vector<2x1x256xf32> to vector<2x256xf32>
    %180 = vector.extract_strided_slice %9 {offsets = [0, 1, 0], sizes = [2, 1, 256], strides = [1, 1, 1]} : vector<2x8x256xf32> to vector<2x1x256xf32>
    %181 = vector.shape_cast %180 : vector<2x1x256xf32> to vector<2x256xf32>
    %182 = vector.shape_cast %28 : vector<1x256xi1> to vector<1x256xi1>
    %183 = vector.broadcast %182 : vector<1x256xi1> to vector<2x256xi1>
    %184 = arith.select %183, %179, %181 : vector<2x256xi1>, vector<2x256xf32>
    %cst_27 = arith.constant dense<0.000000e+00> : vector<2x256xf32>
    %185 = tpu.matmul %177, %1, %cst_27 {dimension_numbers = #tpu.dot_dimension_numbers<[1], [0], [0], [1], [0, 0, 1, 1], [], []>} : vector<2x64xf32>, vector<64x256xf32>, vector<2x256xf32> -> vector<2x256xf32>
    %186 = arith.addf %184, %185 : vector<2x256xf32>
    %187 = arith.negf %186 : vector<2x256xf32>
    %188 = math.exp %187 : vector<2x256xf32>
    %cst_28 = arith.constant 1.000000e+00 : f32
    %189 = vector.broadcast %cst_28 : f32 to vector<2x256xf32>
    %190 = arith.addf %189, %188 : vector<2x256xf32>
    %191 = arith.divf %189, %190 : vector<2x256xf32>
    %192 = vector.extract_strided_slice %191 {offsets = [0, 0], sizes = [2, 64], strides = [1, 1]} : vector<2x256xf32> to vector<2x64xf32>
    %193 = vector.extract_strided_slice %191 {offsets = [0, 64], sizes = [2, 64], strides = [1, 1]} : vector<2x256xf32> to vector<2x64xf32>
    %194 = vector.extract_strided_slice %186 {offsets = [0, 128], sizes = [2, 64], strides = [1, 1]} : vector<2x256xf32> to vector<2x64xf32>
    %195 = math.tanh %194 : vector<2x64xf32>
    %196 = vector.extract_strided_slice %191 {offsets = [0, 192], sizes = [2, 64], strides = [1, 1]} : vector<2x256xf32> to vector<2x64xf32>
    %197 = arith.mulf %193, %175 : vector<2x64xf32>
    %198 = arith.mulf %192, %195 : vector<2x64xf32>
    %199 = arith.addf %197, %198 : vector<2x64xf32>
    %200 = math.tanh %199 : vector<2x64xf32>
    %201 = arith.mulf %196, %200 : vector<2x64xf32>
    %202 = vector.extract_strided_slice %9 {offsets = [0, 7, 0], sizes = [2, 1, 256], strides = [1, 1, 1]} : vector<2x8x256xf32> to vector<2x1x256xf32>
    %203 = vector.shape_cast %202 : vector<2x1x256xf32> to vector<2x256xf32>
    %204 = vector.extract_strided_slice %9 {offsets = [0, 0, 0], sizes = [2, 1, 256], strides = [1, 1, 1]} : vector<2x8x256xf32> to vector<2x1x256xf32>
    %205 = vector.shape_cast %204 : vector<2x1x256xf32> to vector<2x256xf32>
    %206 = vector.shape_cast %28 : vector<1x256xi1> to vector<1x256xi1>
    %207 = vector.broadcast %206 : vector<1x256xi1> to vector<2x256xi1>
    %208 = arith.select %207, %203, %205 : vector<2x256xi1>, vector<2x256xf32>
    %cst_29 = arith.constant dense<0.000000e+00> : vector<2x256xf32>
    %209 = tpu.matmul %201, %1, %cst_29 {dimension_numbers = #tpu.dot_dimension_numbers<[1], [0], [0], [1], [0, 0, 1, 1], [], []>} : vector<2x64xf32>, vector<64x256xf32>, vector<2x256xf32> -> vector<2x256xf32>
    %210 = arith.addf %208, %209 : vector<2x256xf32>
    %211 = arith.negf %210 : vector<2x256xf32>
    %212 = math.exp %211 : vector<2x256xf32>
    %cst_30 = arith.constant 1.000000e+00 : f32
    %213 = vector.broadcast %cst_30 : f32 to vector<2x256xf32>
    %214 = arith.addf %213, %212 : vector<2x256xf32>
    %215 = arith.divf %213, %214 : vector<2x256xf32>
    %216 = vector.extract_strided_slice %215 {offsets = [0, 0], sizes = [2, 64], strides = [1, 1]} : vector<2x256xf32> to vector<2x64xf32>
    %217 = vector.extract_strided_slice %215 {offsets = [0, 64], sizes = [2, 64], strides = [1, 1]} : vector<2x256xf32> to vector<2x64xf32>
    %218 = vector.extract_strided_slice %210 {offsets = [0, 128], sizes = [2, 64], strides = [1, 1]} : vector<2x256xf32> to vector<2x64xf32>
    %219 = math.tanh %218 : vector<2x64xf32>
    %220 = vector.extract_strided_slice %215 {offsets = [0, 192], sizes = [2, 64], strides = [1, 1]} : vector<2x256xf32> to vector<2x64xf32>
    %221 = arith.mulf %217, %199 : vector<2x64xf32>
    %222 = arith.mulf %216, %219 : vector<2x64xf32>
    %223 = arith.addf %221, %222 : vector<2x64xf32>
    %224 = math.tanh %223 : vector<2x64xf32>
    %225 = arith.mulf %220, %224 : vector<2x64xf32>
    %226 = vector.shape_cast %31 : vector<1x64xi1> to vector<1x64xi1>
    %227 = vector.broadcast %226 : vector<1x64xi1> to vector<2x64xi1>
    %228 = arith.select %227, %57, %225 : vector<2x64xi1>, vector<2x64xf32>
    %229 = vector.shape_cast %31 : vector<1x64xi1> to vector<1x64xi1>
    %230 = vector.broadcast %229 : vector<1x64xi1> to vector<2x64xi1>
    %231 = arith.select %230, %81, %201 : vector<2x64xi1>, vector<2x64xf32>
    %232 = vector.shape_cast %31 : vector<1x64xi1> to vector<1x64xi1>
    %233 = vector.broadcast %232 : vector<1x64xi1> to vector<2x64xi1>
    %234 = arith.select %233, %105, %177 : vector<2x64xi1>, vector<2x64xf32>
    %235 = vector.shape_cast %31 : vector<1x64xi1> to vector<1x64xi1>
    %236 = vector.broadcast %235 : vector<1x64xi1> to vector<2x64xi1>
    %237 = arith.select %236, %129, %153 : vector<2x64xi1>, vector<2x64xf32>
    %238 = vector.shape_cast %31 : vector<1x64xi1> to vector<1x64xi1>
    %239 = vector.broadcast %238 : vector<1x64xi1> to vector<2x64xi1>
    %240 = arith.select %239, %153, %129 : vector<2x64xi1>, vector<2x64xf32>
    %241 = vector.shape_cast %31 : vector<1x64xi1> to vector<1x64xi1>
    %242 = vector.broadcast %241 : vector<1x64xi1> to vector<2x64xi1>
    %243 = arith.select %242, %177, %105 : vector<2x64xi1>, vector<2x64xf32>
    %244 = vector.shape_cast %31 : vector<1x64xi1> to vector<1x64xi1>
    %245 = vector.broadcast %244 : vector<1x64xi1> to vector<2x64xi1>
    %246 = arith.select %245, %201, %81 : vector<2x64xi1>, vector<2x64xf32>
    %247 = vector.shape_cast %31 : vector<1x64xi1> to vector<1x64xi1>
    %248 = vector.broadcast %247 : vector<1x64xi1> to vector<2x64xi1>
    %249 = arith.select %248, %225, %57 : vector<2x64xi1>, vector<2x64xf32>
    %250 = vector.shape_cast %228 : vector<2x64xf32> to vector<2x1x64xf32>
    %251 = vector.shape_cast %231 : vector<2x64xf32> to vector<2x1x64xf32>
    %252 = vector.shape_cast %234 : vector<2x64xf32> to vector<2x1x64xf32>
    %253 = vector.shape_cast %237 : vector<2x64xf32> to vector<2x1x64xf32>
    %254 = vector.shape_cast %240 : vector<2x64xf32> to vector<2x1x64xf32>
    %255 = vector.shape_cast %243 : vector<2x64xf32> to vector<2x1x64xf32>
    %256 = vector.shape_cast %246 : vector<2x64xf32> to vector<2x1x64xf32>
    %257 = vector.shape_cast %249 : vector<2x64xf32> to vector<2x1x64xf32>
    %258 = tpu.concatenate %250, %251, %252, %253, %254, %255, %256, %257 in 1 : vector<2x1x64xf32>, vector<2x1x64xf32>, vector<2x1x64xf32>, vector<2x1x64xf32>, vector<2x1x64xf32>, vector<2x1x64xf32>, vector<2x1x64xf32>, vector<2x1x64xf32> -> vector<2x8x64xf32>
    %259 = vector.shape_cast %258 : vector<2x8x64xf32> to vector<16x64xf32>
    %cst_31 = arith.constant dense<0.000000e+00> : vector<16x128xf32>
    %260 = tpu.matmul %259, %3, %cst_31 {dimension_numbers = #tpu.dot_dimension_numbers<[1], [0], [0], [1], [0, 0, 1, 1], [], []>} : vector<16x64xf32>, vector<64x128xf32>, vector<16x128xf32> -> vector<16x128xf32>
    %261 = vector.broadcast %2 : vector<1x128xf32> to vector<16x128xf32>
    %262 = arith.addf %260, %261 : vector<16x128xf32>
    %c0_32 = arith.constant 0 : index
    %c0_33 = arith.constant 0 : index
    %263 = vector.load %arg4[%c0_32, %c0_33] : memref<16x128xf32, #tpu.memory_space<vmem>>, vector<16x128xf32>
    tpu.vector_store %arg4[%c0_32, %c0_33], %262 {strides = array<i32>} : memref<16x128xf32, #tpu.memory_space<vmem>>, vector<16x128xf32>,
    return
  }
  func.func @transform_0(%arg0: i32) -> (i32, i32) {
    %c0_i32 = arith.constant 0 : i32
    %c0_i32_0 = arith.constant 0 : i32
    %c0_i32_1 = arith.constant 0 : i32
    return %c0_i32, %c0_i32_0 : i32, i32
  }
  func.func @transform_1(%arg0: i32) -> (i32, i32) {
    %c0_i32 = arith.constant 0 : i32
    %c0_i32_0 = arith.constant 0 : i32
    %c0_i32_1 = arith.constant 0 : i32
    return %c0_i32, %c0_i32_0 : i32, i32
  }
  func.func @transform_2(%arg0: i32) -> (i32, i32) {
    %c0_i32 = arith.constant 0 : i32
    %c0_i32_0 = arith.constant 0 : i32
    %c0_i32_1 = arith.constant 0 : i32
    return %c0_i32, %c0_i32_0 : i32, i32
  }
  func.func @transform_3(%arg0: i32) -> (i32, i32) {
    %c0_i32 = arith.constant 0 : i32
    %c0_i32_0 = arith.constant 0 : i32
    %c0_i32_1 = arith.constant 0 : i32
    return %c0_i32, %c0_i32_0 : i32, i32
  }
}

</mosaic_0001>

<bundles_post_ra>
// kernel: custom-call.4
= control target key start
LH: loop header
LB: loop body
LE: loop exit
PB: predicated region body
PF: predicated region fallthrough
CT: control target
= control target key end

     0   :  { %s6_s0 = inlined_call_operand.vmem [shape: s32[7,2,3], index: 0, kind: output, shape index: {}]  }

// kernel: custom-call.5
= control target key start
LH: loop header
LB: loop body
LE: loop exit
PB: predicated region body
PF: predicated region fallthrough
CT: control target
= control target key end

     0   :  { %s6_s0 = inlined_call_operand.vmem [shape: s32[7,2], index: 0, kind: output, shape index: {}]  }

// kernel: sentiment_forward.1
= control target key start
LH: loop header
LB: loop body
LE: loop exit
PB: predicated region body
PF: predicated region fallthrough
CT: control target
= control target key end

     0   :  { %8 = vsyncpa [#allocation3], 0  ;;  %s5308_s0 = inlined_call_operand.vmem [shape: bf16[16,2304], index: 0, kind: input, shape index: {}]   ;;  %s5309_s1 = inlined_call_operand.hbm [shape: bf16[2304,256], index: 1, kind: input, shape index: {}]   ;;  %s5310_s2 = inlined_call_operand.hbm [shape: f32[72,384], index: 2, kind: input, shape index: {}]   ;;  %s5311_s3 = inlined_call_operand.vmem [shape: f32[16,128], index: 3, kind: output, shape index: {}]  }
   0x1   :  { %9 = vsyncpa [#allocation5], 0  ;;  %s4755_s12 = smov [#allocation2]   ;;  %s4707_s16 = scalar_lea.hbm %s5309_s1, 36864 }
   0x2   :  { %s17_s13 = sshll.u32 %s4755_s12, 4  ;;  %p4708_p0 = scmp.ne.s32.totalorder %s5309_s1, %s4707_s16  ;;  %s18_s13 = int_to_ptr.vmem [resolvable:$true] %s17_s13 }
   0x3   :  { %p4711_p1 = scmp.lt.u32.totalorder %s4707_s16, %s5309_s1 }
   0x5   :  { %p4713_p2 = pnand %p4711_p1, %p4708_p0 }
   0x7   :  { %4716 = shalt.err (!%p4713_p2)
}
   0x8   :  { %s4717_s21 = scalar_lea.vmem %s18_s13, 36864  ;;  %p4722_p4 = scmp.lt.s32.totalorder %s18_s13, %s18_s13 }
   0x9   :  { %p4718_p3 = scmp.ne.s32.totalorder %s18_s13, %s4717_s21  ;;  %p4723_p5 = scmp.lt.s32.totalorder %s4717_s21, %s4717_s21 }
   0xb   :  { %p4724_p6 = por %p4723_p5, %p4722_p4 }
   0xd   :  { %p4725_p7 = pnand %p4724_p6, %p4718_p3 }
   0xf   :  { %4728 = shalt.err (!%p4725_p7)
}
  0x10   :  { %s4756_s22 = smov 128   ;;  %s4757_s23 = smov 8  }
  0x11   :  { %23 = dma.hbm_to_vmem [thread:$0]  %s5309_s1, 36864, %s18_s13, [#allocation3], %s4756_s22, %s4756_s22, %s4757_s23  }
  0x12   :  { %s4758_s26 = smov [#allocation4]   ;;  %s4729_s30 = scalar_lea.hbm %s5310_s2, 3456 }
  0x13   :  { %s29_s27 = sshll.u32 %s4758_s26, 4  ;;  %p4730_p8 = scmp.ne.s32.totalorder %s5310_s2, %s4729_s30  ;;  %s30_s27 = int_to_ptr.vmem [resolvable:$true] %s29_s27 }
  0x14   :  { %p4733_p9 = scmp.lt.u32.totalorder %s4729_s30, %s5310_s2 }
  0x16   :  { %p4735_p10 = pnand %p4733_p9, %p4730_p8 }
  0x18   :  { %4738 = shalt.err (!%p4735_p10)
}
  0x19   :  { %s4739_s8 = scalar_lea.vmem %s30_s27, 3456  ;;  %p4744_p12 = scmp.lt.s32.totalorder %s30_s27, %s30_s27 }
  0x1a   :  { %p4740_p11 = scmp.ne.s32.totalorder %s30_s27, %s4739_s8  ;;  %p4745_p13 = scmp.lt.s32.totalorder %s4739_s8, %s4739_s8 }
  0x1c   :  { %p4746_p0 = por %p4745_p13, %p4744_p12 }
  0x1e   :  { %p4747_p1 = pnand %p4746_p0, %p4740_p11 }
  0x20   :  { %4750 = shalt.err (!%p4747_p1)
}
  0x21   :  { %s4759_s1 = smov 384   ;;  %s4760_s9 = smov 24  }
  0x22   :  { %35 = dma.hbm_to_vmem [thread:$0]  %s5310_s2, 3456, %s30_s27, [#allocation5], %s4759_s1, %s4759_s1, %s4760_s9  }
  0x23   :  { %4751 = dma.done.wait [#allocation3], 36864  }
  0x24   :  { %4752 = vsyncadd [#allocation3], 4294930432 }
  0x25   :  { %4753 = dma.done.wait [#allocation5], 3456  }
  0x26   :  { %4754 = vsyncadd [#allocation5], 4294963840  ;;  %v4152_v0 = vld [vmem:[#allocation2 + $0x304] ss:$8 sps:$4 sm:$0xff]   ;;  %v4154_v1 = vld [vmem:[#allocation2 + $0x300] ss:$8 sps:$4 sm:$0xff]  }
  0x27   :  { %2044 = vmatprep.subr.bf16.mxu0 %v4152_v0  ;;  %v4155_v2 = vld [vmem:[#allocation2 + $0x314] ss:$8 sps:$4 sm:$0xff]   ;;  %v4157_v3 = vld [vmem:[#allocation2 + $0x310] ss:$8 sps:$4 sm:$0xff]   ;;  %v4158_v4 = vld [vmem:[#allocation2 + $0x324] ss:$8 sps:$4 sm:$0xff]  }
  0x28   :  { %2045 = vmatpush1.bf16.msra.mxu0 %v4154_v1  ;;  %v4160_v5 = vld [vmem:[#allocation2 + $0x320] ss:$8 sps:$4 sm:$0xff]   ;;  %v4161_v6 = vld [vmem:[#allocation2 + $0x334] ss:$8 sps:$4 sm:$0xff]   ;;  %v4163_v7 = vld [vmem:[#allocation2 + $0x330] ss:$8 sps:$4 sm:$0xff]  }
  0x29   :  { %2046 = vmatprep.subr.bf16.mxu0 %v4155_v2  ;;  %v4164_v8 = vld [vmem:[#allocation2 + $0x344] ss:$8 sps:$4 sm:$0xff]   ;;  %v4166_v9 = vld [vmem:[#allocation2 + $0x340] ss:$8 sps:$4 sm:$0xff]   ;;  %v4167_v10 = vld [vmem:[#allocation2 + $0x354] ss:$8 sps:$4 sm:$0xff]  }
  0x2a   :  { %v4169_v11 = vld [vmem:[#allocation2 + $0x350] ss:$8 sps:$4 sm:$0xff]   ;;  %v4194_v12 = vld [vmem:[#allocation2 + $0x4] ss:$8 sps:$4 sm:$0xff]   ;;  %v4196_v13 = vld [vmem:[#allocation2] ss:$8 sps:$4 sm:$0xff]  }
  0x2b   :  { %v4170_v14 = vld [vmem:[#allocation2 + $0x364] ss:$8 sps:$4 sm:$0xff]   ;;  %1915 = vmatprep.subr.bf16.mxu1 %v4194_v12  ;;  %v4200_v15 = vld [vmem:[#allocation2 + $0x14] ss:$8 sps:$4 sm:$0xff]   ;;  %v4202_v16 = vld [vmem:[#allocation2 + $0x10] ss:$8 sps:$4 sm:$0xff]  }
  0x2c   :  { %2047 = vmatpush1.bf16.msra.mxu0 %v4157_v3  ;;  %1916 = vmatpush1.bf16.msra.mxu1 %v4196_v13  ;;  %v4172_v17 = vld [vmem:[#allocation2 + $0x360] ss:$8 sps:$4 sm:$0xff]   ;;  %v4173_v18 = vld [vmem:[#allocation2 + $0x374] ss:$8 sps:$4 sm:$0xff]   ;;  %v4206_v19 = vld [vmem:[#allocation2 + $0x24] ss:$8 sps:$4 sm:$0xff]  }
  0x2d   :  { %2048 = vmatprep.subr.bf16.mxu0 %v4158_v4  ;;  %1917 = vmatprep.subr.bf16.mxu1 %v4200_v15  ;;  %v4208_v20 = vld [vmem:[#allocation2 + $0x20] ss:$8 sps:$4 sm:$0xff]   ;;  %v4211_v21 = vld [vmem:[%s5308_s0 + $0x1c] ss:$72 sps:$4 sm:$0xff]   ;;  %v4175_v22 = vld [vmem:[#allocation2 + $0x370] ss:$8 sps:$4 sm:$0xff]  }
  0x2e   :  { %v4176_v23 = vld [vmem:[#allocation2 + $0x384] ss:$8 sps:$4 sm:$0xff]   ;;  %2076 = vmatprep.mubr.bf16.mxu0 %v4211_v21  ;;  %v4215_v24 = vld [vmem:[#allocation2 + $0x34] ss:$8 sps:$4 sm:$0xff]   ;;  %v4217_v25 = vld [vmem:[#allocation2 + $0x30] ss:$8 sps:$4 sm:$0xff]  }
  0x2f   :  { %v4178_v26 = vld [vmem:[#allocation2 + $0x380] ss:$8 sps:$4 sm:$0xff]   ;;  %v4221_v27 = vld [vmem:[#allocation2 + $0x44] ss:$8 sps:$4 sm:$0xff]   ;;  %v4179_v28 = vld [vmem:[#allocation2 + $0x394] ss:$8 sps:$4 sm:$0xff]  }
  0x30   :  { %2049 = vmatpush1.bf16.msra.mxu0 %v4160_v5  ;;  %1918 = vmatpush1.bf16.msra.mxu1 %v4202_v16  ;;  %v4223_v29 = vld [vmem:[#allocation2 + $0x40] ss:$8 sps:$4 sm:$0xff]   ;;  %v4181_v30 = vld [vmem:[#allocation2 + $0x390] ss:$8 sps:$4 sm:$0xff]   ;;  %v4227_v31 = vld [vmem:[#allocation2 + $0x54] ss:$8 sps:$4 sm:$0xff]  }
  0x31   :  { %2050 = vmatprep.subr.bf16.mxu0 %v4161_v6  ;;  %1919 = vmatprep.subr.bf16.mxu1 %v4206_v19  ;;  %v4182_v32 = vld [vmem:[#allocation2 + $0x3a4] ss:$8 sps:$4 sm:$0xff]   ;;  %v4229_v33 = vld [vmem:[#allocation2 + $0x50] ss:$8 sps:$4 sm:$0xff]   ;;  %v4184_v34 = vld [vmem:[#allocation2 + $0x3a0] ss:$8 sps:$4 sm:$0xff]  }
  0x32   :  { %v4233_v35 = vld [vmem:[#allocation2 + $0x64] ss:$8 sps:$4 sm:$0xff]   ;;  %v4185_v36 = vld [vmem:[#allocation2 + $0x3b4] ss:$8 sps:$4 sm:$0xff]   ;;  %v4235_v37 = vld [vmem:[#allocation2 + $0x60] ss:$8 sps:$4 sm:$0xff]  }
  0x33   :  { %v4187_v38 = vld [vmem:[#allocation2 + $0x3b0] ss:$8 sps:$4 sm:$0xff]   ;;  %v4239_v39 = vld [vmem:[#allocation2 + $0x74] ss:$8 sps:$4 sm:$0xff]   ;;  %v4188_v40 = vld [vmem:[#allocation2 + $0x3c4] ss:$8 sps:$4 sm:$0xff]  }
  0x34   :  { %2051 = vmatpush1.bf16.msra.mxu0 %v4163_v7  ;;  %1920 = vmatpush1.bf16.msra.mxu1 %v4208_v20  ;;  %v4241_v41 = vld [vmem:[#allocation2 + $0x70] ss:$8 sps:$4 sm:$0xff]   ;;  %v4190_v42 = vld [vmem:[#allocation2 + $0x3c0] ss:$8 sps:$4 sm:$0xff]   ;;  %v4245_v43 = vld [vmem:[#allocation2 + $0x84] ss:$8 sps:$4 sm:$0xff]  }
  0x35   :  { %2052 = vmatprep.subr.bf16.mxu0 %v4164_v8  ;;  %1921 = vmatprep.subr.bf16.mxu1 %v4215_v24  ;;  %v4191_v44 = vld [vmem:[#allocation2 + $0x3d4] ss:$8 sps:$4 sm:$0xff]   ;;  %v4247_v45 = vld [vmem:[#allocation2 + $0x80] ss:$8 sps:$4 sm:$0xff]   ;;  %v4193_v46 = vld [vmem:[#allocation2 + $0x3d0] ss:$8 sps:$4 sm:$0xff]  }
  0x36   :  { %v4251_v47 = vld [vmem:[#allocation2 + $0x94] ss:$8 sps:$4 sm:$0xff]   ;;  %v4197_v48 = vld [vmem:[#allocation2 + $0x3e4] ss:$8 sps:$4 sm:$0xff]   ;;  %v4253_v49 = vld [vmem:[#allocation2 + $0x90] ss:$8 sps:$4 sm:$0xff]  }
  0x37   :  { %v4199_v50 = vld [vmem:[#allocation2 + $0x3e0] ss:$8 sps:$4 sm:$0xff]   ;;  %v4257_v51 = vld [vmem:[#allocation2 + $0xa4] ss:$8 sps:$4 sm:$0xff]   ;;  %v4203_v52 = vld [vmem:[#allocation2 + $0x3f4] ss:$8 sps:$4 sm:$0xff]  }
  0x38   :  { %2053 = vmatpush1.bf16.msra.mxu0 %v4166_v9  ;;  %1922 = vmatpush1.bf16.msra.mxu1 %v4217_v25  ;;  %v4259_v53 = vld [vmem:[#allocation2 + $0xa0] ss:$8 sps:$4 sm:$0xff]   ;;  %v4205_v54 = vld [vmem:[#allocation2 + $0x3f0] ss:$8 sps:$4 sm:$0xff]   ;;  %v4263_v55 = vld [vmem:[#allocation2 + $0xb4] ss:$8 sps:$4 sm:$0xff]  }
  0x39   :  { %2054 = vmatprep.subr.bf16.mxu0 %v4167_v10  ;;  %1923 = vmatprep.subr.bf16.mxu1 %v4221_v27  ;;  %v4214_v56 = vld [vmem:[#allocation2 + $0x404] ss:$8 sps:$4 sm:$0xff]   ;;  %v4209_v57 = vld [vmem:[%s5308_s0 + $0x18] ss:$72 sps:$4 sm:$0xff]   ;;  %v4220_v62 = vld [vmem:[#allocation2 + $0x414] ss:$8 sps:$4 sm:$0xff]  }
  0x3a   :  { %v4212_v58 = vld [vmem:[#allocation2 + $0x400] ss:$8 sps:$4 sm:$0xff]   ;;  %v4265_v59 = vld [vmem:[#allocation2 + $0xb0] ss:$8 sps:$4 sm:$0xff]   ;;  %v4269_v60 = vld [vmem:[#allocation2 + $0xc4] ss:$8 sps:$4 sm:$0xff]  }
  0x3b   :  { %v4295_v61 = vld [vmem:[%s5308_s0 + $0x4] ss:$72 sps:$4 sm:$0xff]   ;;  %v4271_v63 = vld [vmem:[#allocation2 + $0xc0] ss:$8 sps:$4 sm:$0xff]   ;;  %v4218_v0 = vld [vmem:[#allocation2 + $0x410] ss:$8 sps:$4 sm:$0xff]  }
  0x3c   :  { %2055 = vmatpush1.bf16.msra.mxu0 %v4169_v11  ;;  %1924 = vmatpush1.bf16.msra.mxu1 %v4223_v29  ;;  %v4275_v1 = vld [vmem:[#allocation2 + $0xd4] ss:$8 sps:$4 sm:$0xff]   ;;  %v4226_v2 = vld [vmem:[#allocation2 + $0x424] ss:$8 sps:$4 sm:$0xff]   ;;  %v4224_v3 = vld [vmem:[#allocation2 + $0x420] ss:$8 sps:$4 sm:$0xff]  }
  0x3d   :  { %2056 = vmatprep.subr.bf16.mxu0 %v4170_v14  ;;  %1925 = vmatprep.subr.bf16.mxu1 %v4227_v31  ;;  %v4277_v4 = vld [vmem:[#allocation2 + $0xd0] ss:$8 sps:$4 sm:$0xff]   ;;  %v4281_v5 = vld [vmem:[#allocation2 + $0xe4] ss:$8 sps:$4 sm:$0xff]   ;;  %v4232_v7 = vld [vmem:[#allocation2 + $0x434] ss:$8 sps:$4 sm:$0xff]  }
  0x3e   :  { %1947 = vmatprep.mubr.bf16.mxu1 %v4295_v61  ;;  %v4313_v6 = vld [vmem:[%s5308_s0 + $0x24] ss:$72 sps:$4 sm:$0xff]   ;;  %v4283_v8 = vld [vmem:[#allocation2 + $0xe0] ss:$8 sps:$4 sm:$0xff]   ;;  %v4230_v9 = vld [vmem:[#allocation2 + $0x430] ss:$8 sps:$4 sm:$0xff]  }
  0x3f   :  { %v4287_v10 = vld [vmem:[#allocation2 + $0xf4] ss:$8 sps:$4 sm:$0xff]   ;;  %v4238_v11 = vld [vmem:[#allocation2 + $0x444] ss:$8 sps:$4 sm:$0xff]   ;;  %v4289_v12 = vld [vmem:[#allocation2 + $0xf0] ss:$8 sps:$4 sm:$0xff]  }
  0x40   :  { %2057 = vmatpush1.bf16.msra.mxu0 %v4172_v17  ;;  %1926 = vmatpush1.bf16.msra.mxu1 %v4229_v33  ;;  %v4236_v13 = vld [vmem:[#allocation2 + $0x440] ss:$8 sps:$4 sm:$0xff]   ;;  %v4298_v14 = vld [vmem:[#allocation2 + $0x104] ss:$8 sps:$4 sm:$0xff]   ;;  %v4244_v15 = vld [vmem:[#allocation2 + $0x454] ss:$8 sps:$4 sm:$0xff]  }
  0x41   :  { %2058 = vmatprep.subr.bf16.mxu0 %v4173_v18  ;;  %1927 = vmatprep.subr.bf16.mxu1 %v4233_v35  ;;  %v4293_v16 = vld [vmem:[%s5308_s0] ss:$72 sps:$4 sm:$0xff]   ;;  %v4242_v18 = vld [vmem:[#allocation2 + $0x450] ss:$8 sps:$4 sm:$0xff]   ;;  %v4304_v19 = vld [vmem:[#allocation2 + $0x114] ss:$8 sps:$4 sm:$0xff]  }
  0x42   :  { %v4296_v17 = vld [vmem:[#allocation2 + $0x100] ss:$8 sps:$4 sm:$0xff]   ;;  %v4250_v20 = vld [vmem:[#allocation2 + $0x464] ss:$8 sps:$4 sm:$0xff]   ;;  %v4302_v21 = vld [vmem:[#allocation2 + $0x110] ss:$8 sps:$4 sm:$0xff]  }
  0x43   :  { %v4256_v24 = vld [vmem:[#allocation2 + $0x474] ss:$8 sps:$4 sm:$0xff]   ;;  %v4308_v25 = vld [vmem:[#allocation2 + $0x120] ss:$8 sps:$4 sm:$0xff]   ;;  %v4317_v29 = vld [vmem:[#allocation2 + $0x130] ss:$8 sps:$4 sm:$0xff]  }
  0x44   :  { %2059 = vmatpush1.bf16.msra.mxu0 %v4175_v22  ;;  %1928 = vmatpush1.bf16.msra.mxu1 %v4235_v37  ;;  %v4248_v22 = vld [vmem:[#allocation2 + $0x460] ss:$8 sps:$4 sm:$0xff]   ;;  %v4319_v27 = vld [vmem:[#allocation2 + $0x134] ss:$8 sps:$4 sm:$0xff]   ;;  %v4325_v31 = vld [vmem:[#allocation2 + $0x144] ss:$8 sps:$4 sm:$0xff]  }
  0x45   :  { %2060 = vmatprep.subr.bf16.mxu0 %v4176_v23  ;;  %1929 = vmatprep.subr.bf16.mxu1 %v4239_v39  ;;  %v4310_v23 = vld [vmem:[#allocation2 + $0x124] ss:$8 sps:$4 sm:$0xff]   ;;  %v4323_v33 = vld [vmem:[#allocation2 + $0x140] ss:$8 sps:$4 sm:$0xff]   ;;  %v4331_v35 = vld [vmem:[#allocation2 + $0x154] ss:$8 sps:$4 sm:$0xff]  }
  0x46   :  { %v4329_v37 = vld [vmem:[#allocation2 + $0x150] ss:$8 sps:$4 sm:$0xff]   ;;  %v4337_v39 = vld [vmem:[#allocation2 + $0x164] ss:$8 sps:$4 sm:$0xff]   ;;  %vm2341_vm1 = vcmask 1041409   ;;  %vm2357_vm3 = vcmask 523264  }
  0x47   :  { %v4316_v61 = vld [vmem:[#allocation2 + $0x504] ss:$8 sps:$4 sm:$0xff]   ;;  %vm3493_vm5 = vcmask 1040384   ;;  %vm3496_vm6 = vcmask 1041408   ;;  %vm3499_vm7 = vcmask 1042432   ;;  %vm3502_vm8 = vcmask 1043456  }
  0x48   :  { %2061 = vmatpush1.bf16.msra.mxu0 %v4178_v26  ;;  %1930 = vmatpush1.bf16.msra.mxu1 %v4241_v41  ;;  %v4254_v26 = vld [vmem:[#allocation2 + $0x470] ss:$8 sps:$4 sm:$0xff]   ;;  %v4335_v41 = vld [vmem:[#allocation2 + $0x160] ss:$8 sps:$4 sm:$0xff]   ;;  %vm3505_vm9 = vcmask 1044480   ;;  %vm3508_vm10 = vcmask 1045504  }
  0x49   :  { %2062 = vmatprep.subr.bf16.mxu0 %v4179_v28  ;;  %1931 = vmatprep.subr.bf16.mxu1 %v4245_v43  ;;  %v4262_v28 = vld [vmem:[#allocation2 + $0x484] ss:$8 sps:$4 sm:$0xff]   ;;  %v4343_v43 = vld [vmem:[#allocation2 + $0x174] ss:$8 sps:$4 sm:$0xff]   ;;  %vm3511_vm11 = vcmask 1046528  }
  0x4c   :  { %2063 = vmatpush1.bf16.msra.mxu0 %v4181_v30  ;;  %1932 = vmatpush1.bf16.msra.mxu1 %v4247_v45  ;;  %v4260_v30 = vld [vmem:[#allocation2 + $0x480] ss:$8 sps:$4 sm:$0xff]   ;;  %v4397_v45 = vld [vmem:[%s5308_s0 + $0xc] ss:$72 sps:$4 sm:$0xff]  }
  0x4d   :  { %2064 = vmatprep.subr.bf16.mxu0 %v4182_v32  ;;  %1933 = vmatprep.subr.bf16.mxu1 %v4251_v47  ;;  %v4268_v32 = vld [vmem:[#allocation2 + $0x494] ss:$8 sps:$4 sm:$0xff]   ;;  %v4284_v47 = vld [vmem:[#allocation2 + $0x4c0] ss:$8 sps:$4 sm:$0xff]  }
  0x50   :  { %2065 = vmatpush1.bf16.msra.mxu0 %v4184_v34  ;;  %1934 = vmatpush1.bf16.msra.mxu1 %v4253_v49  ;;  %v4266_v34 = vld [vmem:[#allocation2 + $0x490] ss:$8 sps:$4 sm:$0xff]   ;;  %v4292_v49 = vld [vmem:[#allocation2 + $0x4d4] ss:$8 sps:$4 sm:$0xff]  }
  0x51   :  { %2066 = vmatprep.subr.bf16.mxu0 %v4185_v36  ;;  %1935 = vmatprep.subr.bf16.mxu1 %v4257_v51  ;;  %v4274_v36 = vld [vmem:[#allocation2 + $0x4a4] ss:$8 sps:$4 sm:$0xff]   ;;  %v4290_v51 = vld [vmem:[#allocation2 + $0x4d0] ss:$8 sps:$4 sm:$0xff]  }
  0x54   :  { %2067 = vmatpush1.bf16.msra.mxu0 %v4187_v38  ;;  %1936 = vmatpush1.bf16.msra.mxu1 %v4259_v53  ;;  %v4272_v38 = vld [vmem:[#allocation2 + $0x4a0] ss:$8 sps:$4 sm:$0xff]   ;;  %v4301_v53 = vld [vmem:[#allocation2 + $0x4e4] ss:$8 sps:$4 sm:$0xff]  }
  0x55   :  { %2068 = vmatprep.subr.bf16.mxu0 %v4188_v40  ;;  %1937 = vmatprep.subr.bf16.mxu1 %v4263_v55  ;;  %v4280_v40 = vld [vmem:[#allocation2 + $0x4b4] ss:$8 sps:$4 sm:$0xff]   ;;  %v4299_v55 = vld [vmem:[#allocation2 + $0x4e0] ss:$8 sps:$4 sm:$0xff]  }
  0x58   :  { %2069 = vmatpush1.bf16.msra.mxu0 %v4190_v42  ;;  %1938 = vmatpush1.bf16.msra.mxu1 %v4265_v59  ;;  %v4278_v42 = vld [vmem:[#allocation2 + $0x4b0] ss:$8 sps:$4 sm:$0xff]  }
  0x59   :  { %2070 = vmatprep.subr.bf16.mxu0 %v4191_v44  ;;  %1939 = vmatprep.subr.bf16.mxu1 %v4269_v60  ;;  %v4286_v44 = vld [vmem:[#allocation2 + $0x4c4] ss:$8 sps:$4 sm:$0xff]   ;;  %v4305_v59 = vld [vmem:[#allocation2 + $0x4f0] ss:$8 sps:$4 sm:$0xff]   ;;  %v4367_v60 = vld [vmem:[#allocation2 + $0x1b4] ss:$8 sps:$4 sm:$0xff]  }
  0x5c   :  { %2071 = vmatpush1.bf16.msra.mxu0 %v4193_v46  ;;  %1940 = vmatpush1.bf16.msra.mxu1 %v4271_v63  ;;  %v4341_v46 = vld [vmem:[#allocation2 + $0x170] ss:$8 sps:$4 sm:$0xff]   ;;  %v4314_v63 = vld [vmem:[#allocation2 + $0x500] ss:$8 sps:$4 sm:$0xff]  }
  0x5d   :  { %2072 = vmatprep.subr.bf16.mxu0 %v4197_v48  ;;  %1941 = vmatprep.subr.bf16.mxu1 %v4275_v1  ;;  %v4349_v48 = vld [vmem:[#allocation2 + $0x184] ss:$8 sps:$4 sm:$0xff]   ;;  %v4322_v1 = vld [vmem:[#allocation2 + $0x514] ss:$8 sps:$4 sm:$0xff]  }
  0x60   :  { %2073 = vmatpush1.bf16.msra.mxu0 %v4199_v50  ;;  %1942 = vmatpush1.bf16.msra.mxu1 %v4277_v4  ;;  %v4347_v50 = vld [vmem:[#allocation2 + $0x180] ss:$8 sps:$4 sm:$0xff]  }
  0x61   :  { %2074 = vmatprep.subr.bf16.mxu0 %v4203_v52  ;;  %1943 = vmatprep.subr.bf16.mxu1 %v4281_v5  ;;  %v4355_v52 = vld [vmem:[#allocation2 + $0x194] ss:$8 sps:$4 sm:$0xff]   ;;  %v4371_v4 = vld [vmem:[#allocation2 + $0x1c0] ss:$8 sps:$4 sm:$0xff]   ;;  %v4320_v5 = vld [vmem:[#allocation2 + $0x510] ss:$8 sps:$4 sm:$0xff]  }
  0x64   :  { %2075 = vmatpush1.bf16.msra.mxu0 %v4205_v54  ;;  %1944 = vmatpush1.bf16.msra.mxu1 %v4283_v8  ;;  %v4353_v54 = vld [vmem:[#allocation2 + $0x190] ss:$8 sps:$4 sm:$0xff]  }
  0x65   :  { %2087 = vmatprep.subr.bf16.mxu0 %v4214_v56  ;;  %1945 = vmatprep.subr.bf16.mxu1 %v4287_v10  ;;  %v4361_v56 = vld [vmem:[#allocation2 + $0x1a4] ss:$8 sps:$4 sm:$0xff]   ;;  %v4377_v8 = vld [vmem:[#allocation2 + $0x1d0] ss:$8 sps:$4 sm:$0xff]  }
  0x66   :  { %v4385_v10 = vld [vmem:[#allocation2 + $0x1e4] ss:$8 sps:$4 sm:$0xff]  }
  0x67   :  { %2077 = vmatmul.mubr.bf16.vlgmr.msra.gmra.mrb[0].mxu0 %v4209_v57  ;;  %v4307_v57 = vld [vmem:[#allocation2 + $0x4f4] ss:$8 sps:$4 sm:$0xff]  }
  0x68   :  { %2088 = vmatpush1.bf16.msra.mxu0 %v4212_v58  ;;  %2119 = vmatprep.mubr.bf16.mxu0 %v4313_v6  ;;  %v4359_v58 = vld [vmem:[#allocation2 + $0x1a0] ss:$8 sps:$4 sm:$0xff]   ;;  %v4379_v6 = vld [vmem:[#allocation2 + $0x1d4] ss:$8 sps:$4 sm:$0xff]  }
  0x69   :  { %2089 = vmatprep.subr.bf16.mxu0 %v4220_v62  ;;  %1946 = vmatpush1.bf16.msra.mxu1 %v4289_v12  ;;  %v4311_v62 = vld [vmem:[%s5308_s0 + $0x20] ss:$72 sps:$4 sm:$0xff]  }
  0x6a   :  { %1958 = vmatprep.subr.bf16.mxu1 %v4298_v14  ;;  %v4383_v12 = vld [vmem:[#allocation2 + $0x1e0] ss:$8 sps:$4 sm:$0xff]   ;;  %v4391_v14 = vld [vmem:[#allocation2 + $0x1f4] ss:$8 sps:$4 sm:$0xff]  }
  0x6c   :  { %2090 = vmatpush1.bf16.msra.mxu0 %v4218_v0  ;;  %1948 = vmatmul.mubr.bf16.vlgmr.msra.gmra.mrb[0].mxu1 %v4293_v16  ;;  %v4365_v0 = vld [vmem:[#allocation2 + $0x1b0] ss:$8 sps:$4 sm:$0xff]  }
  0x6d   :  { %2091 = vmatprep.subr.bf16.mxu0 %v4226_v2  ;;  %1959 = vmatpush1.bf16.msra.mxu1 %v4296_v17  ;;  %v4373_v2 = vld [vmem:[#allocation2 + $0x1c4] ss:$8 sps:$4 sm:$0xff]   ;;  %v4389_v16 = vld [vmem:[#allocation2 + $0x1f0] ss:$8 sps:$4 sm:$0xff]   ;;  %v4338_v17 = vld [vmem:[#allocation2 + $0x540] ss:$8 sps:$4 sm:$0xff]  }
  0x6e   :  { %1960 = vmatprep.subr.bf16.mxu1 %v4304_v19  ;;  %1990 = vmatprep.mubr.bf16.mxu1 %v4397_v45  ;;  %v4346_v19 = vld [vmem:[#allocation2 + $0x554] ss:$8 sps:$4 sm:$0xff]  }
  0x6f   :  { %v4382_v45 = vld [vmem:[#allocation2 + $0x5b4] ss:$8 sps:$4 sm:$0xff]  }
  0x70   :  { %2092 = vmatpush1.bf16.msra.mxu0 %v4224_v3  ;;  %v4415_v3 = vld [vmem:[%s5308_s0 + $0x2c] ss:$72 sps:$4 sm:$0xff]  }
  0x71   :  { %2093 = vmatprep.subr.bf16.mxu0 %v4232_v7  ;;  %1961 = vmatpush1.bf16.msra.mxu1 %v4302_v21  ;;  %v4328_v7 = vld [vmem:[#allocation2 + $0x524] ss:$8 sps:$4 sm:$0xff]   ;;  %v4398_v21 = vld [vmem:[#allocation2 + $0x200] ss:$8 sps:$4 sm:$0xff]  }
  0x72   :  { %1962 = vmatprep.subr.bf16.mxu1 %v4310_v23  ;;  %v4406_v23 = vld [vmem:[#allocation2 + $0x214] ss:$8 sps:$4 sm:$0xff]  }
  0x74   :  { %2094 = vmatpush1.bf16.msra.mxu0 %v4230_v9  ;;  %v4326_v9 = vld [vmem:[#allocation2 + $0x520] ss:$8 sps:$4 sm:$0xff]  }
  0x75   :  { %2095 = vmatprep.subr.bf16.mxu0 %v4238_v11  ;;  %1963 = vmatpush1.bf16.msra.mxu1 %v4308_v25  ;;  %v4334_v11 = vld [vmem:[#allocation2 + $0x534] ss:$8 sps:$4 sm:$0xff]   ;;  %v4404_v25 = vld [vmem:[#allocation2 + $0x210] ss:$8 sps:$4 sm:$0xff]  }
  0x76   :  { %1964 = vmatprep.subr.bf16.mxu1 %v4319_v27  ;;  %v4412_v27 = vld [vmem:[#allocation2 + $0x224] ss:$8 sps:$4 sm:$0xff]  }
  0x78   :  { %2096 = vmatpush1.bf16.msra.mxu0 %v4236_v13  ;;  %v4332_v13 = vld [vmem:[#allocation2 + $0x530] ss:$8 sps:$4 sm:$0xff]  }
  0x79   :  { %2097 = vmatprep.subr.bf16.mxu0 %v4244_v15  ;;  %1965 = vmatpush1.bf16.msra.mxu1 %v4317_v29  ;;  %v4340_v15 = vld [vmem:[#allocation2 + $0x544] ss:$8 sps:$4 sm:$0xff]   ;;  %v4410_v29 = vld [vmem:[#allocation2 + $0x220] ss:$8 sps:$4 sm:$0xff]  }
  0x7a   :  { %1966 = vmatprep.subr.bf16.mxu1 %v4325_v31  ;;  %v4356_v31 = vld [vmem:[#allocation2 + $0x570] ss:$8 sps:$4 sm:$0xff]  }
  0x7c   :  { %2098 = vmatpush1.bf16.msra.mxu0 %v4242_v18  ;;  %v4400_v18 = vld [vmem:[#allocation2 + $0x204] ss:$8 sps:$4 sm:$0xff]  }
  0x7d   :  { %2099 = vmatprep.subr.bf16.mxu0 %v4250_v20  ;;  %1967 = vmatpush1.bf16.msra.mxu1 %v4323_v33  ;;  %v4395_v20 = vld [vmem:[%s5308_s0 + $0x8] ss:$72 sps:$4 sm:$0xff]   ;;  %v4364_v33 = vld [vmem:[#allocation2 + $0x584] ss:$8 sps:$4 sm:$0xff]  }
  0x7e   :  { %1968 = vmatprep.subr.bf16.mxu1 %v4331_v35  ;;  %v4362_v35 = vld [vmem:[#allocation2 + $0x580] ss:$8 sps:$4 sm:$0xff]  }
  0x80   :  { %2100 = vmatpush1.bf16.msra.mxu0 %v4248_v22  ;;  %v4344_v22 = vld [vmem:[#allocation2 + $0x550] ss:$8 sps:$4 sm:$0xff]  }
  0x81   :  { %2101 = vmatprep.subr.bf16.mxu0 %v4256_v24  ;;  %1969 = vmatpush1.bf16.msra.mxu1 %v4329_v37  ;;  %v4352_v24 = vld [vmem:[#allocation2 + $0x564] ss:$8 sps:$4 sm:$0xff]   ;;  %v4370_v37 = vld [vmem:[#allocation2 + $0x594] ss:$8 sps:$4 sm:$0xff]  }
  0x82   :  { %1970 = vmatprep.subr.bf16.mxu1 %v4337_v39  ;;  %v4368_v39 = vld [vmem:[#allocation2 + $0x590] ss:$8 sps:$4 sm:$0xff]  }
  0x84   :  { %2102 = vmatpush1.bf16.msra.mxu0 %v4254_v26  ;;  %v4350_v26 = vld [vmem:[#allocation2 + $0x560] ss:$8 sps:$4 sm:$0xff]  }
  0x85   :  { %2103 = vmatprep.subr.bf16.mxu0 %v4262_v28  ;;  %1971 = vmatpush1.bf16.msra.mxu1 %v4335_v41  ;;  %v4358_v28 = vld [vmem:[#allocation2 + $0x574] ss:$8 sps:$4 sm:$0xff]   ;;  %v4376_v41 = vld [vmem:[#allocation2 + $0x5a4] ss:$8 sps:$4 sm:$0xff]  }
  0x86   :  { %1972 = vmatprep.subr.bf16.mxu1 %v4343_v43  ;;  %v4374_v43 = vld [vmem:[#allocation2 + $0x5a0] ss:$8 sps:$4 sm:$0xff]  }
  0x88   :  { %2104 = vmatpush1.bf16.msra.mxu0 %v4260_v30  ;;  %v4499_v30 = vld [vmem:[%s5308_s0 + $0x14] ss:$72 sps:$4 sm:$0xff]  }
  0x89   :  { %2105 = vmatprep.subr.bf16.mxu0 %v4268_v32  ;;  %1973 = vmatpush1.bf16.msra.mxu1 %v4341_v46  ;;  %v4421_v32 = vld [vmem:[#allocation2 + $0x234] ss:$8 sps:$4 sm:$0xff]   ;;  %v4437_v46 = vld [vmem:[#allocation2 + $0x260] ss:$8 sps:$4 sm:$0xff]  }
  0x8a   :  { %1974 = vmatprep.subr.bf16.mxu1 %v4349_v48  ;;  %v4445_v48 = vld [vmem:[#allocation2 + $0x274] ss:$8 sps:$4 sm:$0xff]  }
  0x8c   :  { %2106 = vmatpush1.bf16.msra.mxu0 %v4266_v34  ;;  %v4419_v34 = vld [vmem:[#allocation2 + $0x230] ss:$8 sps:$4 sm:$0xff]  }
  0x8d   :  { %2107 = vmatprep.subr.bf16.mxu0 %v4274_v36  ;;  %1975 = vmatpush1.bf16.msra.mxu1 %v4347_v50  ;;  %v4427_v36 = vld [vmem:[#allocation2 + $0x244] ss:$8 sps:$4 sm:$0xff]   ;;  %v4386_v50 = vld [vmem:[#allocation2 + $0x5c0] ss:$8 sps:$4 sm:$0xff]  }
  0x8e   :  { %1976 = vmatprep.subr.bf16.mxu1 %v4355_v52  ;;  %v4394_v52 = vld [vmem:[#allocation2 + $0x5d4] ss:$8 sps:$4 sm:$0xff]  }
  0x90   :  { %2108 = vmatpush1.bf16.msra.mxu0 %v4272_v38  ;;  %v4425_v38 = vld [vmem:[#allocation2 + $0x240] ss:$8 sps:$4 sm:$0xff]  }
  0x91   :  { %2109 = vmatprep.subr.bf16.mxu0 %v4280_v40  ;;  %1977 = vmatpush1.bf16.msra.mxu1 %v4353_v54  ;;  %v4433_v40 = vld [vmem:[#allocation2 + $0x254] ss:$8 sps:$4 sm:$0xff]   ;;  %v4449_v54 = vld [vmem:[#allocation2 + $0x280] ss:$8 sps:$4 sm:$0xff]  }
  0x92   :  { %1978 = vmatprep.subr.bf16.mxu1 %v4361_v56  ;;  %v4403_v56 = vld [vmem:[#allocation2 + $0x5e4] ss:$8 sps:$4 sm:$0xff]  }
  0x94   :  { %2110 = vmatpush1.bf16.msra.mxu0 %v4278_v42  ;;  %v4431_v42 = vld [vmem:[#allocation2 + $0x250] ss:$8 sps:$4 sm:$0xff]  }
  0x95   :  { %2111 = vmatprep.subr.bf16.mxu0 %v4286_v44  ;;  %1979 = vmatpush1.bf16.msra.mxu1 %v4359_v58  ;;  %v4439_v44 = vld [vmem:[#allocation2 + $0x264] ss:$8 sps:$4 sm:$0xff]   ;;  %v4455_v58 = vld [vmem:[#allocation2 + $0x290] ss:$8 sps:$4 sm:$0xff]  }
  0x96   :  { %1980 = vmatprep.subr.bf16.mxu1 %v4367_v60  ;;  %v4409_v60 = vld [vmem:[#allocation2 + $0x5f4] ss:$8 sps:$4 sm:$0xff]  }
  0x98   :  { %2112 = vmatpush1.bf16.msra.mxu0 %v4284_v47  ;;  %v4380_v47 = vld [vmem:[#allocation2 + $0x5b0] ss:$8 sps:$4 sm:$0xff]  }
  0x99   :  { %2113 = vmatprep.subr.bf16.mxu0 %v4292_v49  ;;  %1981 = vmatpush1.bf16.msra.mxu1 %v4365_v0  ;;  %v4388_v49 = vld [vmem:[#allocation2 + $0x5c4] ss:$8 sps:$4 sm:$0xff]  }
  0x9a   :  { %1982 = vmatprep.subr.bf16.mxu1 %v4373_v2  ;;  %v4418_v0 = vld [vmem:[#allocation2 + $0x604] ss:$8 sps:$4 sm:$0xff]   ;;  %v4413_v2 = vld [vmem:[%s5308_s0 + $0x28] ss:$72 sps:$4 sm:$0xff]  }
  0x9c   :  { %2114 = vmatpush1.bf16.msra.mxu0 %v4290_v51  ;;  %v4443_v51 = vld [vmem:[#allocation2 + $0x270] ss:$8 sps:$4 sm:$0xff]  }
  0x9d   :  { %2115 = vmatprep.subr.bf16.mxu0 %v4301_v53  ;;  %1983 = vmatpush1.bf16.msra.mxu1 %v4371_v4  ;;  %v4451_v53 = vld [vmem:[#allocation2 + $0x284] ss:$8 sps:$4 sm:$0xff]   ;;  %v4416_v4 = vld [vmem:[#allocation2 + $0x600] ss:$8 sps:$4 sm:$0xff]  }
  0x9e   :  { %1984 = vmatprep.subr.bf16.mxu1 %v4379_v6  ;;  %v4475_v6 = vld [vmem:[#allocation2 + $0x2c4] ss:$8 sps:$4 sm:$0xff]  }
  0xa0   :  { %2116 = vmatpush1.bf16.msra.mxu0 %v4299_v55  ;;  %v4392_v55 = vld [vmem:[#allocation2 + $0x5d0] ss:$8 sps:$4 sm:$0xff]  }
  0xa1   :  { %2117 = vmatprep.subr.bf16.mxu0 %v4307_v57  ;;  %1985 = vmatpush1.bf16.msra.mxu1 %v4377_v8  ;;  %v4457_v57 = vld [vmem:[#allocation2 + $0x294] ss:$8 sps:$4 sm:$0xff]   ;;  %v4473_v8 = vld [vmem:[#allocation2 + $0x2c0] ss:$8 sps:$4 sm:$0xff]  }
  0xa2   :  { %1986 = vmatprep.subr.bf16.mxu1 %v4385_v10  ;;  %v4481_v10 = vld [vmem:[#allocation2 + $0x2d4] ss:$8 sps:$4 sm:$0xff]  }
  0xa4   :  { %2118 = vmatpush1.bf16.msra.mxu0 %v4305_v59  ;;  %v4401_v59 = vld [vmem:[#allocation2 + $0x5e0] ss:$8 sps:$4 sm:$0xff]  }
  0xa5   :  { %2130 = vmatprep.subr.bf16.mxu0 %v4316_v61  ;;  %1987 = vmatpush1.bf16.msra.mxu1 %v4383_v12  ;;  %v4463_v61 = vld [vmem:[#allocation2 + $0x2a4] ss:$8 sps:$4 sm:$0xff]   ;;  %v4479_v12 = vld [vmem:[#allocation2 + $0x2d0] ss:$8 sps:$4 sm:$0xff]  }
  0xa6   :  { %1988 = vmatprep.subr.bf16.mxu1 %v4391_v14  ;;  %v4487_v14 = vld [vmem:[#allocation2 + $0x2e4] ss:$8 sps:$4 sm:$0xff]  }
  0xa7   :  { %2120 = vmatmul.mubr.bf16.vlgmr.msra.gmra.mrb[0].mxu0 %v4311_v62  ;;  %v4461_v62 = vld [vmem:[#allocation2 + $0x2a0] ss:$8 sps:$4 sm:$0xff]  }
  0xa8   :  { %2131 = vmatpush1.bf16.msra.mxu0 %v4314_v63  ;;  %2162 = vmatprep.mubr.bf16.mxu0 %v4415_v3  ;;  %v4407_v63 = vld [vmem:[#allocation2 + $0x5f0] ss:$8 sps:$4 sm:$0xff]  }
  0xa9   :  { %2132 = vmatprep.subr.bf16.mxu0 %v4322_v1  ;;  %1989 = vmatpush1.bf16.msra.mxu1 %v4389_v16  ;;  %v4469_v1 = vld [vmem:[#allocation2 + $0x2b4] ss:$8 sps:$4 sm:$0xff]   ;;  %v4467_v3 = vld [vmem:[#allocation2 + $0x2b0] ss:$8 sps:$4 sm:$0xff]   ;;  %v4485_v16 = vld [vmem:[#allocation2 + $0x2e0] ss:$8 sps:$4 sm:$0xff]  }
  0xaa   :  { %2001 = vmatprep.subr.bf16.mxu1 %v4400_v18  ;;  %v4493_v18 = vld [vmem:[#allocation2 + $0x2f4] ss:$8 sps:$4 sm:$0xff]  }
  0xac   :  { %2133 = vmatpush1.bf16.msra.mxu0 %v4320_v5  ;;  %1991 = vmatmul.mubr.bf16.vlgmr.msra.gmra.mrb[0].mxu1 %v4395_v20  ;;  %v4424_v5 = vld [vmem:[#allocation2 + $0x614] ss:$8 sps:$4 sm:$0xff]   ;;  %v4491_v20 = vld [vmem:[#allocation2 + $0x2f0] ss:$8 sps:$4 sm:$0xff]  }
  0xad   :  { %2134 = vmatprep.subr.bf16.mxu0 %v4328_v7  ;;  %2002 = vmatpush1.bf16.msra.mxu1 %v4398_v21  ;;  %v4508_v7 = vld [vmem:[%s5308_s0 + $0x34] ss:$72 sps:$4 sm:$0xff]   ;;  %v4440_v21 = vld [vmem:[#allocation2 + $0x640] ss:$8 sps:$4 sm:$0xff]  }
  0xae   :  { %2003 = vmatprep.subr.bf16.mxu1 %v4406_v23  ;;  %2033 = vmatprep.mubr.bf16.mxu1 %v4499_v30  ;;  %v4497_v23 = vld [vmem:[%s5308_s0 + $0x10] ss:$72 sps:$4 sm:$0xff]   ;;  %v4464_v30 = vld [vmem:[#allocation2 + $0x680] ss:$8 sps:$4 sm:$0xff]  }
  0xb0   :  { %2135 = vmatpush1.bf16.msra.mxu0 %v4326_v9  ;;  %v4422_v9 = vld [vmem:[#allocation2 + $0x610] ss:$8 sps:$4 sm:$0xff]  }
  0xb1   :  { %2136 = vmatprep.subr.bf16.mxu0 %v4334_v11  ;;  %2004 = vmatpush1.bf16.msra.mxu1 %v4404_v25  ;;  %v4430_v11 = vld [vmem:[#allocation2 + $0x624] ss:$8 sps:$4 sm:$0xff]  }
  0xb2   :  { %2005 = vmatprep.subr.bf16.mxu1 %v4412_v27  ;;  %v4454_v25 = vld [vmem:[#allocation2 + $0x664] ss:$8 sps:$4 sm:$0xff]   ;;  %v4460_v27 = vld [vmem:[#allocation2 + $0x674] ss:$8 sps:$4 sm:$0xff]  }
  0xb4   :  { %2137 = vmatpush1.bf16.msra.mxu0 %v4332_v13  ;;  %v4428_v13 = vld [vmem:[#allocation2 + $0x620] ss:$8 sps:$4 sm:$0xff]  }
  0xb5   :  { %2138 = vmatprep.subr.bf16.mxu0 %v4340_v15  ;;  %2006 = vmatpush1.bf16.msra.mxu1 %v4410_v29  ;;  %v4436_v15 = vld [vmem:[#allocation2 + $0x634] ss:$8 sps:$4 sm:$0xff]   ;;  %v4466_v29 = vld [vmem:[#allocation2 + $0x684] ss:$8 sps:$4 sm:$0xff]  }
  0xb6   :  { %2007 = vmatprep.subr.bf16.mxu1 %v4421_v32  ;;  %v4470_v32 = vld [vmem:[#allocation2 + $0x690] ss:$8 sps:$4 sm:$0xff]  }
  0xb8   :  { %2139 = vmatpush1.bf16.msra.mxu0 %v4338_v17  ;;  %v4434_v17 = vld [vmem:[#allocation2 + $0x630] ss:$8 sps:$4 sm:$0xff]  }
  0xb9   :  { %2140 = vmatprep.subr.bf16.mxu0 %v4346_v19  ;;  %2008 = vmatpush1.bf16.msra.mxu1 %v4419_v34  ;;  %v4442_v19 = vld [vmem:[#allocation2 + $0x644] ss:$8 sps:$4 sm:$0xff]   ;;  %v4476_v34 = vld [vmem:[#allocation2 + $0x6a0] ss:$8 sps:$4 sm:$0xff]  }
  0xba   :  { %2009 = vmatprep.subr.bf16.mxu1 %v4427_v36  ;;  %v4482_v36 = vld [vmem:[#allocation2 + $0x6b0] ss:$8 sps:$4 sm:$0xff]  }
  0xbc   :  { %2141 = vmatpush1.bf16.msra.mxu0 %v4344_v22  ;;  %v4448_v22 = vld [vmem:[#allocation2 + $0x654] ss:$8 sps:$4 sm:$0xff]  }
  0xbd   :  { %2142 = vmatprep.subr.bf16.mxu0 %v4352_v24  ;;  %2010 = vmatpush1.bf16.msra.mxu1 %v4425_v38  ;;  %v4446_v24 = vld [vmem:[#allocation2 + $0x650] ss:$8 sps:$4 sm:$0xff]   ;;  %v4488_v38 = vld [vmem:[#allocation2 + $0x6c0] ss:$8 sps:$4 sm:$0xff]  }
  0xbe   :  { %2011 = vmatprep.subr.bf16.mxu1 %v4433_v40  ;;  %v4494_v40 = vld [vmem:[#allocation2 + $0x6d0] ss:$8 sps:$4 sm:$0xff]  }
  0xc0   :  { %2143 = vmatpush1.bf16.msra.mxu0 %v4350_v26  ;;  %v4452_v26 = vld [vmem:[#allocation2 + $0x660] ss:$8 sps:$4 sm:$0xff]  }
  0xc1   :  { %2144 = vmatprep.subr.bf16.mxu0 %v4358_v28  ;;  %2012 = vmatpush1.bf16.msra.mxu1 %v4431_v42  ;;  %v4458_v28 = vld [vmem:[#allocation2 + $0x670] ss:$8 sps:$4 sm:$0xff]   ;;  %v44_v42 = vld [vmem:[#allocation4 + $0x20] sm:$0xff] }
  0xc2   :  { %2013 = vmatprep.subr.bf16.mxu1 %v4439_v44  ;;  %v4500_v44 = vld [vmem:[#allocation2 + $0x6e0] ss:$8 sps:$4 sm:$0xff]  }
  0xc4   :  { %2145 = vmatpush1.bf16.msra.mxu0 %v4356_v31  ;;  %v4472_v31 = vld [vmem:[#allocation2 + $0x694] ss:$8 sps:$4 sm:$0xff]  }
  0xc5   :  { %2146 = vmatprep.subr.bf16.mxu0 %v4364_v33  ;;  %2014 = vmatpush1.bf16.msra.mxu1 %v4437_v46  ;;  %v4478_v33 = vld [vmem:[#allocation2 + $0x6a4] ss:$8 sps:$4 sm:$0xff]   ;;  %v43_v46 = vld [vmem:[#allocation4 + $0x18] sm:$0xff] }
  0xc6   :  { %2015 = vmatprep.subr.bf16.mxu1 %v4445_v48  ;;  %v45_v48 = vld [vmem:[#allocation4 + $0x30] sm:$0xff] }
  0xc8   :  { %2147 = vmatpush1.bf16.msra.mxu0 %v4362_v35  ;;  %v4484_v35 = vld [vmem:[#allocation2 + $0x6b4] ss:$8 sps:$4 sm:$0xff]  }
  0xc9   :  { %2148 = vmatprep.subr.bf16.mxu0 %v4370_v37  ;;  %2016 = vmatpush1.bf16.msra.mxu1 %v4443_v51  ;;  %v4490_v37 = vld [vmem:[#allocation2 + $0x6c4] ss:$8 sps:$4 sm:$0xff]  }
  0xca   :  { %2017 = vmatprep.subr.bf16.mxu1 %v4451_v53  ;;  %v50_v51 = vld [vmem:[#allocation4 + $0x68] sm:$0xff] }
  0xcc   :  { %2149 = vmatpush1.bf16.msra.mxu0 %v4368_v39  ;;  %v4496_v39 = vld [vmem:[#allocation2 + $0x6d4] ss:$8 sps:$4 sm:$0xff]  }
  0xcd   :  { %2150 = vmatprep.subr.bf16.mxu0 %v4376_v41  ;;  %2018 = vmatpush1.bf16.msra.mxu1 %v4449_v54  ;;  %v4502_v41 = vld [vmem:[#allocation2 + $0x6e4] ss:$8 sps:$4 sm:$0xff]  }
  0xce   :  { %2019 = vmatprep.subr.bf16.mxu1 %v4457_v57  ;;  %v47_v54 = vld [vmem:[#allocation4 + $0x48] sm:$0xff] }
  0xd0   :  { %2151 = vmatpush1.bf16.msra.mxu0 %v4374_v43  ;;  %v46_v43 = vld [vmem:[#allocation4 + $0x38] sm:$0xff] }
  0xd1   :  { %2152 = vmatprep.subr.bf16.mxu0 %v4382_v45  ;;  %2020 = vmatpush1.bf16.msra.mxu1 %v4455_v58  ;;  %v4847_v45 = vpack.c.bf16 %v46_v43, %v44_v42  ;;  %v4506_v58 = vld [vmem:[%s5308_s0 + $0x30] ss:$72 sps:$4 sm:$0xff]   ;;  %v4560_v42 = vld [vmem:[#allocation2 + $0x800] ss:$8 sps:$4 sm:$0xff]   ;;  %v4610_v43 = vld [vmem:[%s5308_s0 + $0x44] ss:$72 sps:$4 sm:$0xff]  }
  0xd2   :  { %2021 = vmatprep.subr.bf16.mxu1 %v4463_v61  ;;  %v4509_v61 = vld [vmem:[#allocation2 + $0x700] ss:$8 sps:$4 sm:$0xff]  }
  0xd4   :  { %2153 = vmatpush1.bf16.msra.mxu0 %v4380_v47  ;;  %v4505_v47 = vld [vmem:[#allocation2 + $0x6f4] ss:$8 sps:$4 sm:$0xff]  }
  0xd5   :  { %2154 = vmatprep.subr.bf16.mxu0 %v4388_v49  ;;  %2022 = vmatpush1.bf16.msra.mxu1 %v4461_v62  ;;  %v4850_v49 = vpack.c.bf16 %v45_v48, %v43_v46  ;;  %v4559_v62 = vld [vmem:[%s5308_s0 + $0x3c] ss:$72 sps:$4 sm:$0xff]   ;;  %v4563_v46 = vld [vmem:[#allocation2 + $0x810] ss:$8 sps:$4 sm:$0xff]   ;;  %v4566_v48 = vld [vmem:[#allocation2 + $0x820] ss:$8 sps:$4 sm:$0xff]  }
  0xd6   :  { %2023 = vmatprep.subr.bf16.mxu1 %v4469_v1  ;;  %v4514_v1 = vld [vmem:[#allocation2 + $0x714] ss:$8 sps:$4 sm:$0xff]  }
  0xd8   :  { %2155 = vmatpush1.bf16.msra.mxu0 %v4386_v50  ;;  %v48_v50 = vld [vmem:[#allocation4 + $0x50] sm:$0xff] }
  0xd9   :  { %2156 = vmatprep.subr.bf16.mxu0 %v4394_v52  ;;  %2024 = vmatpush1.bf16.msra.mxu1 %v4467_v3  ;;  %v4503_v52 = vld [vmem:[#allocation2 + $0x6f0] ss:$8 sps:$4 sm:$0xff]   ;;  %v4853_v53 = vpack.c.bf16 %v50_v51, %v48_v50  ;;  %v4571_v50 = vld [vmem:[#allocation2 + $0x834] ss:$8 sps:$4 sm:$0xff]  }
  0xda   :  { %2025 = vmatprep.subr.bf16.mxu1 %v4475_v6  ;;  %v55_v6 = vld [vmem:[#allocation4 + $0xa8] sm:$0xff]  ;;  %v4569_v51 = vld [vmem:[#allocation2 + $0x830] ss:$8 sps:$4 sm:$0xff]  }
  0xdc   :  { %2157 = vmatpush1.bf16.msra.mxu0 %v4392_v55  ;;  %v4511_v55 = vld [vmem:[#allocation2 + $0x704] ss:$8 sps:$4 sm:$0xff]  }
  0xdd   :  { %2158 = vmatprep.subr.bf16.mxu0 %v4403_v56  ;;  %2026 = vmatpush1.bf16.msra.mxu1 %v4473_v8  ;;  %v49_v56 = vld [vmem:[#allocation4 + $0x60] sm:$0xff] }
  0xde   :  { %2027 = vmatprep.subr.bf16.mxu1 %v4481_v10  ;;  %v4856_v57 = vpack.c.bf16 %v49_v56, %v47_v54  ;;  %v4517_v10 = vld [vmem:[#allocation2 + $0x724] ss:$8 sps:$4 sm:$0xff]   ;;  %v4572_v54 = vld [vmem:[#allocation2 + $0x840] ss:$8 sps:$4 sm:$0xff]   ;;  %v4575_v56 = vld [vmem:[#allocation2 + $0x850] ss:$8 sps:$4 sm:$0xff]  }
  0xe0   :  { %2159 = vmatpush1.bf16.msra.mxu0 %v4401_v59  ;;  %v52_v59 = vld [vmem:[#allocation4 + $0x80] sm:$0xff] }
  0xe1   :  { %2160 = vmatprep.subr.bf16.mxu0 %v4409_v60  ;;  %2028 = vmatpush1.bf16.msra.mxu1 %v4479_v12  ;;  %v54_v60 = vld [vmem:[#allocation4 + $0x98] sm:$0xff]  ;;  %v4761_v12 = vmov 0.0  }
  0xe2   :  { %2029 = vmatprep.subr.bf16.mxu1 %v4487_v14  ;;  %v4520_v14 = vld [vmem:[#allocation2 + $0x734] ss:$8 sps:$4 sm:$0xff]  }
  0xe4   :  { %2161 = vmatpush1.bf16.msra.mxu0 %v4407_v63  ;;  %v4865_v63 = vpack.c.bf16 %v54_v60, %v52_v59  ;;  %v4578_v59 = vld [vmem:[#allocation2 + $0x860] ss:$8 sps:$4 sm:$0xff]   ;;  %v4583_v60 = vld [vmem:[#allocation2 + $0x874] ss:$8 sps:$4 sm:$0xff]  }
  0xe5   :  { %2173 = vmatprep.subr.bf16.mxu0 %v4418_v0  ;;  %2030 = vmatpush1.bf16.msra.mxu1 %v4485_v16  ;;  %v51_v0 = vld [vmem:[#allocation4 + $0x78] sm:$0xff]  ;;  %v4523_v16 = vld [vmem:[#allocation2 + $0x744] ss:$8 sps:$4 sm:$0xff]  }
  0xe6   :  { %2031 = vmatprep.subr.bf16.mxu1 %v4493_v18  ;;  %v4526_v18 = vld [vmem:[#allocation2 + $0x754] ss:$8 sps:$4 sm:$0xff]  }
  0xe7   :  { %2163 = vmatmul.mubr.bf16.vlgmr.msra.gmra.mrb[0].mxu0 %v4413_v2  ;;  %v53_v2 = vld [vmem:[#allocation4 + $0x90] sm:$0xff] }
  0xe8   :  { %2174 = vmatpush1.bf16.msra.mxu0 %v4416_v4  ;;  %2205 = vmatprep.mubr.bf16.mxu0 %v4508_v7  ;;  %v4868_v3 = vpack.c.bf16 %v53_v2, %v51_v0  ;;  %v56_v4 = vld [vmem:[#allocation4 + $0xb0] sm:$0xff]  ;;  %v4584_v0 = vld [vmem:[#allocation2 + $0x880] ss:$8 sps:$4 sm:$0xff]  }
  0xe9   :  { %2175 = vmatprep.subr.bf16.mxu0 %v4424_v5  ;;  %2032 = vmatpush1.bf16.msra.mxu1 %v4491_v20  ;;  %v58_v5 = vld [vmem:[#allocation4 + $0xc8] sm:$0xff]  ;;  %v4512_v7 = vld [vmem:[#allocation2 + $0x710] ss:$8 sps:$4 sm:$0xff]  }
  0xea   :  { %3964 = vmatprep.subr.bf16.mxu1 %v4847_v45  ;;  %v4870_v8 = vpack.c.bf16 %v58_v5, %v56_v4  ;;  %v4529_v20 = vld [vmem:[#allocation2 + $0x764] ss:$8 sps:$4 sm:$0xff]   ;;  %v4587_v2 = vld [vmem:[#allocation2 + $0x890] ss:$8 sps:$4 sm:$0xff]   ;;  %v4590_v5 = vld [vmem:[#allocation2 + $0x8a0] ss:$8 sps:$4 sm:$0xff]  }
  0xeb   :  { %v4592_v4 = vld [vmem:[#allocation2 + $0x8a4] ss:$8 sps:$4 sm:$0xff]  }
  0xec   :  { %2176 = vmatpush1.bf16.msra.mxu0 %v4422_v9  ;;  %2034 = vmatmul.mubr.bf16.vlgmr.msra.gmra.mrb[0].mxu1 %v4497_v23  ;;  %v57_v9 = vld [vmem:[#allocation4 + $0xc0] sm:$0xff]  ;;  %v4530_v23 = vld [vmem:[#allocation2 + $0x770] ss:$8 sps:$4 sm:$0xff]  }
  0xed   :  { %2177 = vmatprep.subr.bf16.mxu0 %v4430_v11  ;;  %3966 = vmatpush1.bf16.msra.mxu1 %v4850_v49  ;;  %v4873_v11 = vpack.c.bf16 %v57_v9, %v55_v6  ;;  %v4595_v6 = vld [vmem:[#allocation2 + $0x8b4] ss:$8 sps:$4 sm:$0xff]   ;;  %v4598_v9 = vld [vmem:[#allocation2 + $0x8c4] ss:$8 sps:$4 sm:$0xff]  }
  0xee   :  { %3968 = vmatprep.subr.bf16.mxu1 %v4853_v53  ;;  %2425 = vmatprep.mubr.f32.mxu1 %v4761_v12 }
  0xf0   :  { %2178 = vmatpush1.bf16.msra.mxu0 %v4428_v13  ;;  %v4515_v13 = vld [vmem:[#allocation2 + $0x720] ss:$8 sps:$4 sm:$0xff]  }
  0xf1   :  { %2179 = vmatprep.subr.bf16.mxu0 %v4436_v15  ;;  %3970 = vmatpush1.bf16.msra.mxu1 %v4856_v57  ;;  %v4518_v15 = vld [vmem:[#allocation2 + $0x730] ss:$8 sps:$4 sm:$0xff]  }
  0xf2   :  { %3972 = vmatprep.subr.bf16.mxu1 %v4865_v63 }
  0xf4   :  { %2180 = vmatpush1.bf16.msra.mxu0 %v4434_v17  ;;  %v4521_v17 = vld [vmem:[#allocation2 + $0x740] ss:$8 sps:$4 sm:$0xff]  }
  0xf5   :  { %2181 = vmatprep.subr.bf16.mxu0 %v4442_v19  ;;  %3974 = vmatpush1.bf16.msra.mxu1 %v4868_v3  ;;  %v4524_v19 = vld [vmem:[#allocation2 + $0x750] ss:$8 sps:$4 sm:$0xff]  }
  0xf6   :  { %3976 = vmatprep.subr.bf16.mxu1 %v4870_v8 }
  0xf8   :  { %2182 = vmatpush1.bf16.msra.mxu0 %v4440_v21  ;;  %v4527_v21 = vld [vmem:[#allocation2 + $0x760] ss:$8 sps:$4 sm:$0xff]  }
  0xf9   :  { %2183 = vmatprep.subr.bf16.mxu0 %v4448_v22  ;;  %3978 = vmatpush1.bf16.msra.mxu1 %v4873_v11  ;;  %v4532_v22 = vld [vmem:[#allocation2 + $0x774] ss:$8 sps:$4 sm:$0xff]  }
  0xfa   :  { %3980 = vmatprep.subr.bf16.mxu1 %v4847_v45 }
  0xfc   :  { %2184 = vmatpush1.bf16.msra.mxu0 %v4446_v24  ;;  %2426 = vmatmul.mubr.f32.vlgmr.msra.gmra.mrb[4].mxu1 %v4761_v12  ;;  %v4535_v24 = vld [vmem:[#allocation2 + $0x784] ss:$8 sps:$4 sm:$0xff]  }
  0xfd   :  { %2185 = vmatprep.subr.bf16.mxu0 %v4454_v25  ;;  %3982 = vmatpush1.bf16.msra.mxu1 %v4850_v49  ;;  %v4533_v25 = vld [vmem:[#allocation2 + $0x780] ss:$8 sps:$4 sm:$0xff]  }
  0xfe   :  { %3984 = vmatprep.subr.bf16.mxu1 %v4853_v53  ;;  %2541 = vmatprep.mubr.f32.mxu1 %v4761_v12 }
 0x100   :  { %2186 = vmatpush1.bf16.msra.mxu0 %v4452_v26  ;;  %v4538_v26 = vld [vmem:[#allocation2 + $0x794] ss:$8 sps:$4 sm:$0xff]  }
 0x101   :  { %2187 = vmatprep.subr.bf16.mxu0 %v4460_v27  ;;  %3986 = vmatpush1.bf16.msra.mxu1 %v4856_v57  ;;  %v4536_v27 = vld [vmem:[#allocation2 + $0x790] ss:$8 sps:$4 sm:$0xff]  }
 0x102   :  { %3988 = vmatprep.subr.bf16.mxu1 %v4865_v63 }
 0x104   :  { %2188 = vmatpush1.bf16.msra.mxu0 %v4458_v28  ;;  %v4541_v28 = vld [vmem:[#allocation2 + $0x7a4] ss:$8 sps:$4 sm:$0xff]  }
 0x105   :  { %2189 = vmatprep.subr.bf16.mxu0 %v4466_v29  ;;  %3990 = vmatpush1.bf16.msra.mxu1 %v4868_v3  ;;  %v4539_v29 = vld [vmem:[#allocation2 + $0x7a0] ss:$8 sps:$4 sm:$0xff]  }
 0x106   :  { %3992 = vmatprep.subr.bf16.mxu1 %v4870_v8 }
 0x108   :  { %2190 = vmatpush1.bf16.msra.mxu0 %v4464_v30  ;;  %v4544_v30 = vld [vmem:[#allocation2 + $0x7b4] ss:$8 sps:$4 sm:$0xff]  }
 0x109   :  { %2191 = vmatprep.subr.bf16.mxu0 %v4472_v31  ;;  %3994 = vmatpush1.bf16.msra.mxu1 %v4873_v11  ;;  %v4542_v31 = vld [vmem:[#allocation2 + $0x7b0] ss:$8 sps:$4 sm:$0xff]  }
 0x10a   :  { %3996 = vmatprep.subr.bf16.mxu1 %v4847_v45 }
 0x10c   :  { %2192 = vmatpush1.bf16.msra.mxu0 %v4470_v32  ;;  %v4547_v32 = vld [vmem:[#allocation2 + $0x7c4] ss:$8 sps:$4 sm:$0xff]  }
 0x10d   :  { %2193 = vmatprep.subr.bf16.mxu0 %v4478_v33  ;;  %v4545_v33 = vld [vmem:[#allocation2 + $0x7c0] ss:$8 sps:$4 sm:$0xff]  }
 0x110   :  { %2194 = vmatpush1.bf16.msra.mxu0 %v4476_v34  ;;  %v4550_v34 = vld [vmem:[#allocation2 + $0x7d4] ss:$8 sps:$4 sm:$0xff]  }
 0x111   :  { %2195 = vmatprep.subr.bf16.mxu0 %v4484_v35  ;;  %v4548_v35 = vld [vmem:[#allocation2 + $0x7d0] ss:$8 sps:$4 sm:$0xff]  }
 0x114   :  { %2196 = vmatpush1.bf16.msra.mxu0 %v4482_v36  ;;  %v4553_v36 = vld [vmem:[#allocation2 + $0x7e4] ss:$8 sps:$4 sm:$0xff]  }
 0x115   :  { %2197 = vmatprep.subr.bf16.mxu0 %v4490_v37  ;;  %v4551_v37 = vld [vmem:[#allocation2 + $0x7e0] ss:$8 sps:$4 sm:$0xff]  }
 0x118   :  { %2198 = vmatpush1.bf16.msra.mxu0 %v4488_v38  ;;  %v4556_v38 = vld [vmem:[#allocation2 + $0x7f4] ss:$8 sps:$4 sm:$0xff]  }
 0x119   :  { %2199 = vmatprep.subr.bf16.mxu0 %v4496_v39  ;;  %v4554_v39 = vld [vmem:[#allocation2 + $0x7f0] ss:$8 sps:$4 sm:$0xff]  }
 0x11c   :  { %2200 = vmatpush1.bf16.msra.mxu0 %v4494_v40  ;;  %v4562_v40 = vld [vmem:[#allocation2 + $0x804] ss:$8 sps:$4 sm:$0xff]  }
 0x11d   :  { %2201 = vmatprep.subr.bf16.mxu0 %v4502_v41  ;;  %v4557_v41 = vld [vmem:[%s5308_s0 + $0x38] ss:$72 sps:$4 sm:$0xff]  }
 0x120   :  { %2202 = vmatpush1.bf16.msra.mxu0 %v4500_v44  ;;  %v4565_v44 = vld [vmem:[#allocation2 + $0x814] ss:$8 sps:$4 sm:$0xff]  }
 0x121   :  { %2203 = vmatprep.subr.bf16.mxu0 %v4505_v47  ;;  %v4568_v47 = vld [vmem:[#allocation2 + $0x824] ss:$8 sps:$4 sm:$0xff]  }
 0x124   :  { %2204 = vmatpush1.bf16.msra.mxu0 %v4503_v52  ;;  %v4574_v52 = vld [vmem:[#allocation2 + $0x844] ss:$8 sps:$4 sm:$0xff]  }
 0x125   :  { %2216 = vmatprep.subr.bf16.mxu0 %v4511_v55  ;;  %v4577_v55 = vld [vmem:[#allocation2 + $0x854] ss:$8 sps:$4 sm:$0xff]  }
 0x127   :  { %2206 = vmatmul.mubr.bf16.vlgmr.msra.gmra.mrb[0].mxu0 %v4506_v58  ;;  %v4580_v58 = vld [vmem:[#allocation2 + $0x864] ss:$8 sps:$4 sm:$0xff]  }
 0x128   :  { %2217 = vmatpush1.bf16.msra.mxu0 %v4509_v61  ;;  %2248 = vmatprep.mubr.bf16.mxu0 %v4559_v62  ;;  %v4581_v61 = vld [vmem:[#allocation2 + $0x870] ss:$8 sps:$4 sm:$0xff]   ;;  %v4586_v62 = vld [vmem:[#allocation2 + $0x884] ss:$8 sps:$4 sm:$0xff]  }
 0x129   :  { %2218 = vmatprep.subr.bf16.mxu0 %v4514_v1  ;;  %v4589_v1 = vld [vmem:[#allocation2 + $0x894] ss:$8 sps:$4 sm:$0xff]  }
 0x12c   :  { %2219 = vmatpush1.bf16.msra.mxu0 %v4512_v7  ;;  %v4593_v7 = vld [vmem:[#allocation2 + $0x8b0] ss:$8 sps:$4 sm:$0xff]  }
 0x12d   :  { %2220 = vmatprep.subr.bf16.mxu0 %v4517_v10  ;;  %v4596_v10 = vld [vmem:[#allocation2 + $0x8c0] ss:$8 sps:$4 sm:$0xff]  }
 0x130   :  { %2221 = vmatpush1.bf16.msra.mxu0 %v4515_v13  ;;  %v4601_v13 = vld [vmem:[#allocation2 + $0x8d4] ss:$8 sps:$4 sm:$0xff]  }
 0x131   :  { %2222 = vmatprep.subr.bf16.mxu0 %v4520_v14  ;;  %v4599_v14 = vld [vmem:[#allocation2 + $0x8d0] ss:$8 sps:$4 sm:$0xff]  }
 0x134   :  { %2223 = vmatpush1.bf16.msra.mxu0 %v4518_v15  ;;  %v4604_v15 = vld [vmem:[#allocation2 + $0x8e4] ss:$8 sps:$4 sm:$0xff]  }
 0x135   :  { %2224 = vmatprep.subr.bf16.mxu0 %v4523_v16  ;;  %v4602_v16 = vld [vmem:[#allocation2 + $0x8e0] ss:$8 sps:$4 sm:$0xff]  }
 0x138   :  { %2225 = vmatpush1.bf16.msra.mxu0 %v4521_v17  ;;  %v4607_v17 = vld [vmem:[#allocation2 + $0x8f4] ss:$8 sps:$4 sm:$0xff]  }
 0x139   :  { %2226 = vmatprep.subr.bf16.mxu0 %v4526_v18  ;;  %v4605_v18 = vld [vmem:[#allocation2 + $0x8f0] ss:$8 sps:$4 sm:$0xff]  }
 0x13c   :  { %2227 = vmatpush1.bf16.msra.mxu0 %v4524_v19  ;;  %v4608_v19 = vld [vmem:[%s5308_s0 + $0x40] ss:$72 sps:$4 sm:$0xff]   ;;  %s4762_s0 = smov 64  }
 0x13d   :  { %2228 = vmatprep.subr.bf16.mxu0 %v4529_v20 }
 0x140   :  { %2229 = vmatpush1.bf16.msra.mxu0 %v4527_v21 }
 0x141   :  { %2230 = vmatprep.subr.bf16.mxu0 %v4532_v22 }
 0x144   :  { %2231 = vmatpush1.bf16.msra.mxu0 %v4530_v23 }
 0x145   :  { %2232 = vmatprep.subr.bf16.mxu0 %v4535_v24 }
 0x148   :  { %2233 = vmatpush1.bf16.msra.mxu0 %v4533_v25 }
 0x149   :  { %2234 = vmatprep.subr.bf16.mxu0 %v4538_v26  ;;  %v375_v26 = vlaneseq }
 0x14c   :  { %2235 = vmatpush1.bf16.msra.mxu0 %v4536_v27  ;;  %v4898_v27 = vshrl.u32 %v375_v26, 7 }
 0x14d   :  { %2236 = vmatprep.subr.bf16.mxu0 %v4541_v28  ;;  %v4900_v28 = vand.u32 127, %v375_v26 }
 0x14f   :  { %vm2331_vm4 = vcmp.lt.s32.totalorder %v4900_v28, 32 }
 0x150   :  { %2237 = vmatpush1.bf16.msra.mxu0 %v4539_v29  ;;  %v4903_v29 = vsub.s32 0, %v4898_v27 }
 0x151   :  { %2238 = vmatprep.subr.bf16.mxu0 %v4544_v30  ;;  %v42_v30 = vld [vmem:[#allocation4] ss:$8 sm:$0x3] }
 0x154   :  { %2239 = vmatpush1.bf16.msra.mxu0 %v4542_v31  ;;  %v381_v31 = vsub.s32 1, %v4898_v27 }
 0x155   :  { %2240 = vmatprep.subr.bf16.mxu0 %v4547_v32  ;;  %v2304_v32 = vadd.s32 128, %v4900_v28 }
 0x158   :  { %2241 = vmatpush1.bf16.msra.mxu0 %v4545_v33  ;;  %v378_v33 = vrot.slane %v42_v30, %v4903_v29 }
 0x159   :  { %2242 = vmatprep.subr.bf16.mxu0 %v4550_v34  ;;  %v382_v34 = vrot.slane %v42_v30, %v381_v31 }
 0x15c   :  { %2243 = vmatpush1.bf16.msra.mxu0 %v4548_v35  ;;  %v2309_v35 = vand.u32 63, %v4900_v28 }
 0x15d   :  { %2244 = vmatprep.subr.bf16.mxu0 %v4553_v36  ;;  %v2316_v36 = vand.u32 63, %v2304_v32 }
 0x15e   :  { %vm4913_vm0 = vcmp.lt.s32.totalorder %v2309_v35, 32 }
 0x15f   :  { %vm4917_vm2 = vcmp.lt.s32.totalorder %v2316_v36, 32 }
 0x160   :  { %2245 = vmatpush1.bf16.msra.mxu0 %v4551_v37 }
 0x161   :  { %2246 = vmatprep.subr.bf16.mxu0 %v4556_v38 }
 0x164   :  { %2247 = vmatpush1.bf16.msra.mxu0 %v4554_v39 }
 0x165   :  { %2259 = vmatprep.subr.bf16.mxu0 %v4562_v40 }
 0x167   :  { %2249 = vmatmul.mubr.bf16.vlgmr.msra.gmra.mrb[0].mxu0 %v4557_v41 }
 0x168   :  { %2260 = vmatpush1.bf16.msra.mxu0 %v4560_v42  ;;  %2291 = vmatprep.mubr.bf16.mxu0 %v4610_v43 }
 0x169   :  { %2261 = vmatprep.subr.bf16.mxu0 %v4565_v44 }
 0x16c   :  { %2262 = vmatpush1.bf16.msra.mxu0 %v4563_v46 }
 0x16d   :  { %2263 = vmatprep.subr.bf16.mxu0 %v4568_v47 }
 0x170   :  { %2264 = vmatpush1.bf16.msra.mxu0 %v4566_v48 }
 0x171   :  { %2265 = vmatprep.subr.bf16.mxu0 %v4571_v50 }
 0x174   :  { %2266 = vmatpush1.bf16.msra.mxu0 %v4569_v51 }
 0x175   :  { %2267 = vmatprep.subr.bf16.mxu0 %v4574_v52 }
 0x178   :  { %2268 = vmatpush1.bf16.msra.mxu0 %v4572_v54 }
 0x179   :  { %2269 = vmatprep.subr.bf16.mxu0 %v4577_v55 }
 0x17c   :  { %2270 = vmatpush1.bf16.msra.mxu0 %v4575_v56 }
 0x17d   :  { %2271 = vmatprep.subr.bf16.mxu0 %v4580_v58 }
 0x180   :  { %2272 = vmatpush1.bf16.msra.mxu0 %v4578_v59 }
 0x181   :  { %2273 = vmatprep.subr.bf16.mxu0 %v4583_v60 }
 0x184   :  { %2274 = vmatpush1.bf16.msra.mxu0 %v4581_v61 }
 0x185   :  { %2275 = vmatprep.subr.bf16.mxu0 %v4586_v62 }
 0x188   :  { %2276 = vmatpush1.bf16.msra.mxu0 %v4584_v0 }
 0x189   :  { %2277 = vmatprep.subr.bf16.mxu0 %v4589_v1 }
 0x18c   :  { %2278 = vmatpush1.bf16.msra.mxu0 %v4587_v2 }
 0x18d   :  { %2279 = vmatprep.subr.bf16.mxu0 %v4592_v4 }
 0x190   :  { %2280 = vmatpush1.bf16.msra.mxu0 %v4590_v5 }
 0x191   :  { %2281 = vmatprep.subr.bf16.mxu0 %v4595_v6 }
 0x194   :  { %2282 = vmatpush1.bf16.msra.mxu0 %v4593_v7 }
 0x195   :  { %2283 = vmatprep.subr.bf16.mxu0 %v4598_v9 }
 0x198   :  { %2284 = vmatpush1.bf16.msra.mxu0 %v4596_v10 }
 0x199   :  { %2285 = vmatprep.subr.bf16.mxu0 %v4601_v13 }
 0x19c   :  { %2286 = vmatpush1.bf16.msra.mxu0 %v4599_v14 }
 0x19d   :  { %2287 = vmatprep.subr.bf16.mxu0 %v4604_v15 }
 0x1a0   :  { %2288 = vmatpush1.bf16.msra.mxu0 %v4602_v16 }
 0x1a1   :  { %2289 = vmatprep.subr.bf16.mxu0 %v4607_v17 }
 0x1a4   :  { %2290 = vmatpush1.bf16.msra.mxu0 %v4605_v18 }
 0x1a7   :  { %2292 = vmatmul.mubr.bf16.vlgmr.msra.gmra.mrb[0].mxu0 %v4608_v19 }
 0x1bf   :  { %v2035_v20 = vpop.f32.mrb[0].mxu1 }
 0x1c0   :  { %v2037_v21 = vpop.f32.mrb[1].mxu1  ;;  %v4107_v37 = vadd.f32 %v2035_v20, %v378_v33 }
 0x1c1   :  { %v2039_v22 = vpop.f32.mrb[2].mxu1  ;;  %v4109_v38 = vadd.f32 %v2037_v21, %v382_v34 }
 0x1c2   :  { %v2041_v23 = vpop.f32.mrb[3].mxu1  ;;  %v4111_v40 = vadd.f32 %v2039_v22, %v378_v33 }
 0x1c3   :  { %v4113_v41 = vadd.f32 %v2041_v23, %v382_v34 }
 0x1cf   :  { %v2427_v24 = vpop.f32.mrb[4].mxu1 }
 0x1d0   :  { %v2429_v25 = vpop.f32.mrb[5].mxu1 }
 0x27a   :  { %v2293_v39 = vpop.f32.mrb[0].mxu0 }
 0x27b   :  { %v4909_v42 = vadd.f32 %v4107_v37, %v2293_v39  ;;  %v2295_v43 = vpop.f32.mrb[1].mxu0 }
 0x27c   :  { %v4911_v44 = vadd.f32 %v4109_v38, %v2295_v43  ;;  %v2297_v46 = vpop.f32.mrb[2].mxu0 }
 0x27d   :  { %v4112_v50 = vadd.f32 %v4111_v40, %v2297_v46  ;;  %v2299_v51 = vpop.f32.mrb[3].mxu0  ;;  %v2347_v52 = vrot.slane %v4909_v42, 7  ;;  %v2456_v54 = vrot.slane %v4909_v42, 1  ;;  %v2462_v55 = vrot.slane %v4909_v42, 6 }
 0x27e   :  { %v4114_v56 = vadd.f32 %v4113_v41, %v2299_v51  ;;  %v2350_v58 = vrot.slane %v4911_v44, 7  ;;  %v2458_v59 = vrot.slane %v4911_v44, 1  ;;  %v2465_v60 = vrot.slane %v4911_v44, 6 }
 0x27f   :  { %v2340_v61 = vrot.slane %v4112_v50, 7  ;;  %v2348_v62 = vrot.slane %v4112_v50, 6  ;;  %v4928_v0 = vsel %vm2341_vm1, %v4112_v50, %v2456_v54  ;;  %v2463_v1 = vrot.slane %v4112_v50, 5 }
 0x280   :  { %v2343_v2 = vrot.slane %v4114_v56, 7  ;;  %v2351_v4 = vrot.slane %v4114_v56, 6  ;;  %v4931_v5 = vsel %vm2341_vm1, %v4114_v56, %v2458_v59  ;;  %v2466_v6 = vrot.slane %v4114_v56, 5 }
 0x281   :  { %v4935_v7 = vsel %vm2341_vm1, %v2340_v61, %v4909_v42  ;;  %v4938_v9 = vsel %vm2341_vm1, %v2348_v62, %v2347_v52  ;;  %v4941_v10 = vsel %vm2341_vm1, %v2463_v1, %v2462_v55  ;;  %v2572_v13 = vrot.slane %v4909_v42, 2 }
 0x282   :  { %v2355_v14 = vsel %vm4913_vm0, %v4935_v7, %v4938_v9  ;;  %v4950_v15 = vsel %vm2341_vm1, %v2343_v2, %v4911_v44  ;;  %v4953_v16 = vsel %vm2341_vm1, %v2351_v4, %v2350_v58  ;;  %v2470_v17 = vsel %vm4913_vm0, %v4928_v0, %v4941_v10 }
 0x283   :  { %v2432_v18 = vadd.f32 %v2427_v24, %v2355_v14  ;;  %v2356_v19 = vsel %vm4917_vm2, %v4950_v15, %v4953_v16  ;;  %v4964_v20 = vsel %vm2341_vm1, %v2466_v6, %v2465_v60  ;;  %v2573_v21 = vrot.slane %v4112_v50, 1 }
 0x284   :  { %v2433_v22 = vadd.f32 %v2429_v25, %v2356_v19  ;;  %v2471_v23 = vsel %vm4917_vm2, %v4931_v5, %v4964_v20  ;;  %v2580_v26 = vrot.slane %v4909_v42, 5  ;;  %v2581_v30 = vrot.slane %v4112_v50, 4 }
 0x285   :  { %v3909_v31 = vmul.f32 -1.442695, %v2432_v18  ;;  %v4972_v24 = vsel %vm2341_vm1, %v2573_v21, %v2572_v13  ;;  %v2575_v32 = vrot.slane %v4911_v44, 2  ;;  %v2576_v33 = vrot.slane %v4114_v56, 1 }
 0x286   :  { %v4976_v34 = vsel %vm2341_vm1, %v2581_v30, %v2580_v26  ;;  %v2583_v25 = vrot.slane %v4911_v44, 5  ;;  %v2584_v37 = vrot.slane %v4114_v56, 4  ;;  %v2690_v38 = vrot.slane %v4909_v42, 3 }
 0x287   :  { %4611 = vpow2.f32 %v3909_v31  ;;  %v2588_v35 = vsel %vm4913_vm0, %v4972_v24, %v4976_v34  ;;  %v4984_v36 = vsel %vm2341_vm1, %v2576_v33, %v2575_v32  ;;  %v2691_v39 = vrot.slane %v4112_v50, 2 }
 0x288   :  { %v2698_v40 = vrot.slane %v4909_v42, 4  ;;  %v4989_v41 = vsel %vm2341_vm1, %v2584_v37, %v2583_v25  ;;  %v2699_v43 = vrot.slane %v4112_v50, 3  ;;  %v2693_v46 = vrot.slane %v4911_v44, 3 }
 0x289   :  { %v2694_v51 = vrot.slane %v4114_v56, 2  ;;  %v2589_v52 = vsel %vm4917_vm2, %v4984_v36, %v4989_v41  ;;  %v4997_v54 = vsel %vm2341_vm1, %v2691_v39, %v2690_v38  ;;  %v2701_v55 = vrot.slane %v4911_v44, 4 }
 0x28a   :  { %v2702_v58 = vrot.slane %v4114_v56, 3  ;;  %v5001_v42 = vsel %vm2341_vm1, %v2699_v43, %v2698_v40  ;;  %v2910_v50 = vsel %vm4913_vm0, %v4976_v34, %v4972_v24  ;;  %v2911_v60 = vsel %vm4917_vm2, %v4989_v41, %v4984_v36 }
 0x28b   :  { %v5004_v59 = vsel %vm2341_vm1, %v2694_v51, %v2693_v46  ;;  %v2706_v44 = vsel %vm4913_vm0, %v4997_v54, %v5001_v42  ;;  %v2808_v61 = vsel %vm4913_vm0, %v5001_v42, %v4997_v54  ;;  %v3012_v62 = vsel %vm4913_vm0, %v4941_v10, %v4928_v0 }
 0x28c   :  { %v5019_v56 = vsel %vm2341_vm1, %v2702_v58, %v2701_v55  ;;  %v3013_v4 = vsel %vm4917_vm2, %v4964_v20, %v4931_v5  ;;  %v3114_v6 = vsel %vm4913_vm0, %v4938_v9, %v4935_v7  ;;  %v3115_v13 = vsel %vm4917_vm2, %v4953_v16, %v4950_v15  ;;  %v60_v7 = vld [vmem:[#allocation4 + $0x28] sm:$0xff]  ;;  %v61_v9 = vld [vmem:[#allocation4 + $0x40] sm:$0xff] }
 0x28d   :  { %v2707_v1 = vsel %vm4917_vm2, %v5004_v59, %v5019_v56  ;;  %v2809_v2 = vsel %vm4917_vm2, %v5019_v56, %v5004_v59  ;;  %4613 = vtanh.f32 %v2433_v22  ;;  %v3910_v30 = vmul.f32 -1.442695, %v2433_v22 }
 0x291   :  { %v4612_v14 = vpop.eup %4611 }
 0x292   :  { %v2440_v18 = vadd.f32 1.0, %v4612_v14 }
 0x294   :  { %4615 = vrcp.f32 %v2440_v18 }
 0x295   :  { %4617 = vpow2.f32 %v3910_v30 }
 0x297   :  { %v4614_v19 = vpop.eup %4613 }
 0x29e   :  { %v4616_v21 = vpop.eup %4615 }
 0x29f   :  { %v2448_v26 = vmul.f32 %v4616_v21, %v4614_v19  ;;  %v4618_v31 = vpop.eup %4617  ;;  %v2447_v33 = vmul.f32 0.0, %v4616_v21 }
 0x2a0   :  { %v2441_v32 = vadd.f32 1.0, %v4618_v31 }
 0x2a1   :  { %2450 = vrot.lane.b32.xlu0 %v2448_v26, %s4762_s0 }
 0x2a2   :  { %4619 = vrcp.f32 %v2441_v32 }
 0x2ac   :  { %v4620_v38 = vpop.eup %4619 }
 0x313   :  { %v2451_v25 = vpop.permute.xlu0 %2450 }
 0x314   :  { %v2453_v37 = vadd.f32 %v2451_v25, %v2447_v33 }
 0x316   :  { %4621 = vtanh.f32 %v2453_v37 }
 0x320   :  { %v4622_v39 = vpop.eup %4621 }
 0x321   :  { %v2455_v40 = vmul.f32 %v4622_v39, %v4620_v38 }
 0x323   :  { %2473 = vrot.lane.b32.xlu0 %v2455_v40, %s4762_s0 }
 0x395   :  { %v5051_v43 = vpop.permute.xlu0 %2473 }
 0x396   :  { %3911 = vmatmul.mubr.msk.f32.vlgmr.msra.gmra.mrb[6].mxu1 %vm2357_vm3, %v5051_v43 }
 0x397   :  { %3998 = vmatpush1.bf16.msra.mxu1 %v4850_v49  ;;  %2659 = vmatprep.mubr.f32.mxu1 %v4761_v12 }
 0x398   :  { %4000 = vmatprep.subr.bf16.mxu1 %v4853_v53 }
 0x39b   :  { %4002 = vmatpush1.bf16.msra.mxu1 %v4856_v57 }
 0x39c   :  { %4004 = vmatprep.subr.bf16.mxu1 %v4865_v63 }
 0x39f   :  { %4006 = vmatpush1.bf16.msra.mxu1 %v4868_v3 }
 0x3a0   :  { %4008 = vmatprep.subr.bf16.mxu1 %v4870_v8 }
 0x3a3   :  { %4010 = vmatpush1.bf16.msra.mxu1 %v4873_v11 }
 0x3a4   :  { %4012 = vmatprep.subr.bf16.mxu1 %v4847_v45 }
 0x469   :  { %v2543_v22 = vpop.f32.mrb[6].mxu1 }
 0x46a   :  { %v2548_v46 = vadd.f32 %v2543_v22, %v2470_v17  ;;  %v2545_v51 = vpop.f32.mrb[7].mxu1 }
 0x46b   :  { %v2549_v55 = vadd.f32 %v2545_v51, %v2471_v23 }
 0x46c   :  { %v3912_v58 = vmul.f32 -1.442695, %v2548_v46 }
 0x46d   :  { %v3913_v30 = vmul.f32 -1.442695, %v2549_v55 }
 0x46e   :  { %4623 = vpow2.f32 %v3912_v58 }
 0x46f   :  { %4625 = vtanh.f32 %v2549_v55 }
 0x478   :  { %v4624_v14 = vpop.eup %4623 }
 0x479   :  { %v2556_v18 = vadd.f32 1.0, %v4624_v14  ;;  %v4626_v19 = vpop.eup %4625 }
 0x47b   :  { %4627 = vrcp.f32 %v2556_v18 }
 0x47c   :  { %4629 = vpow2.f32 %v3913_v30 }
 0x485   :  { %v4628_v21 = vpop.eup %4627 }
 0x486   :  { %v2564_v26 = vmul.f32 %v4628_v21, %v4626_v19  ;;  %v4630_v17 = vpop.eup %4629  ;;  %v2563_v32 = vmul.f32 %v4628_v21, %v2453_v37 }
 0x487   :  { %v2557_v31 = vadd.f32 1.0, %v4630_v17 }
 0x488   :  { %2566 = vrot.lane.b32.xlu1 %v2564_v26, %s4762_s0 }
 0x489   :  { %4631 = vrcp.f32 %v2557_v31 }
 0x493   :  { %v4632_v23 = vpop.eup %4631 }
 0x4fa   :  { %v2567_v33 = vpop.permute.xlu1 %2566 }
 0x4fb   :  { %v2569_v25 = vadd.f32 %v2567_v33, %v2563_v32 }
 0x4fd   :  { %4633 = vtanh.f32 %v2569_v25 }
 0x507   :  { %v4634_v38 = vpop.eup %4633 }
 0x508   :  { %v2571_v39 = vmul.f32 %v4634_v38, %v4632_v23 }
 0x50a   :  { %2591 = vrot.lane.b32.xlu1 %v2571_v39, %s4762_s0 }
 0x57c   :  { %v5076_v40 = vpop.permute.xlu1 %2591 }
 0x57d   :  { %3914 = vmatmul.mubr.msk.f32.vlgmr.msra.gmra.mrb[8].mxu1 %vm2357_vm3, %v5076_v40 }
 0x57e   :  { %4014 = vmatpush1.bf16.msra.mxu1 %v4850_v49  ;;  %2777 = vmatprep.mubr.f32.mxu1 %v4761_v12 }
 0x57f   :  { %4016 = vmatprep.subr.bf16.mxu1 %v4853_v53 }
 0x582   :  { %4018 = vmatpush1.bf16.msra.mxu1 %v4856_v57 }
 0x583   :  { %4020 = vmatprep.subr.bf16.mxu1 %v4865_v63 }
 0x586   :  { %4022 = vmatpush1.bf16.msra.mxu1 %v4868_v3 }
 0x587   :  { %4024 = vmatprep.subr.bf16.mxu1 %v4870_v8 }
 0x58a   :  { %4026 = vmatpush1.bf16.msra.mxu1 %v4873_v11 }
 0x58b   :  { %4028 = vmatprep.subr.bf16.mxu1 %v4847_v45 }
 0x650   :  { %v2661_v37 = vpop.f32.mrb[8].mxu1 }
 0x651   :  { %v2666_v22 = vadd.f32 %v2661_v37, %v2588_v35  ;;  %v2663_v46 = vpop.f32.mrb[9].mxu1 }
 0x652   :  { %v2667_v51 = vadd.f32 %v2663_v46, %v2589_v52 }
 0x653   :  { %v3915_v55 = vmul.f32 -1.442695, %v2666_v22 }
 0x654   :  { %v3916_v26 = vmul.f32 -1.442695, %v2667_v51 }
 0x655   :  { %4635 = vpow2.f32 %v3915_v55 }
 0x656   :  { %4637 = vtanh.f32 %v2667_v51 }
 0x65f   :  { %v4636_v58 = vpop.eup %4635 }
 0x660   :  { %v2674_v14 = vadd.f32 1.0, %v4636_v58  ;;  %v4638_v18 = vpop.eup %4637 }
 0x662   :  { %4639 = vrcp.f32 %v2674_v14 }
 0x663   :  { %4641 = vpow2.f32 %v3916_v26 }
 0x66c   :  { %v4640_v19 = vpop.eup %4639 }
 0x66d   :  { %v2682_v21 = vmul.f32 %v4640_v19, %v4638_v18  ;;  %v4642_v35 = vpop.eup %4641  ;;  %v2681_v17 = vmul.f32 %v4640_v19, %v2569_v25 }
 0x66e   :  { %v2675_v30 = vadd.f32 1.0, %v4642_v35 }
 0x66f   :  { %2684 = vrot.lane.b32.xlu0 %v2682_v21, %s4762_s0 }
 0x670   :  { %4643 = vrcp.f32 %v2675_v30 }
 0x67a   :  { %v4644_v52 = vpop.eup %4643 }
 0x6e1   :  { %v2685_v31 = vpop.permute.xlu0 %2684 }
 0x6e2   :  { %v2687_v32 = vadd.f32 %v2685_v31, %v2681_v17 }
 0x6e4   :  { %4645 = vtanh.f32 %v2687_v32 }
 0x6ee   :  { %v4646_v33 = vpop.eup %4645 }
 0x6ef   :  { %v2689_v23 = vmul.f32 %v4646_v33, %v4644_v52 }
 0x6f1   :  { %2709 = vrot.lane.b32.xlu1 %v2689_v23, %s4762_s0 }
 0x763   :  { %v5101_v38 = vpop.permute.xlu1 %2709 }
 0x764   :  { %3917 = vmatmul.mubr.msk.f32.vlgmr.msra.gmra.mrb[10].mxu1 %vm2357_vm3, %v5101_v38 }
 0x765   :  { %4030 = vmatpush1.bf16.msra.mxu1 %v4850_v49  ;;  %2879 = vmatprep.mubr.f32.mxu1 %v4761_v12 }
 0x766   :  { %4032 = vmatprep.subr.bf16.mxu1 %v4853_v53 }
 0x769   :  { %4034 = vmatpush1.bf16.msra.mxu1 %v4856_v57 }
 0x76a   :  { %4036 = vmatprep.subr.bf16.mxu1 %v4865_v63 }
 0x76d   :  { %4038 = vmatpush1.bf16.msra.mxu1 %v4868_v3 }
 0x76e   :  { %4040 = vmatprep.subr.bf16.mxu1 %v4870_v8 }
 0x771   :  { %4042 = vmatpush1.bf16.msra.mxu1 %v4873_v11 }
 0x772   :  { %4044 = vmatprep.subr.bf16.mxu1 %v4847_v45 }
 0x837   :  { %v2779_v25 = vpop.f32.mrb[10].mxu1 }
 0x838   :  { %v2784_v39 = vadd.f32 %v2779_v25, %v2706_v44  ;;  %v2781_v37 = vpop.f32.mrb[11].mxu1 }
 0x839   :  { %v2785_v22 = vadd.f32 %v2781_v37, %v2707_v1 }
 0x83a   :  { %v3918_v46 = vmul.f32 -1.442695, %v2784_v39 }
 0x83b   :  { %v3919_v19 = vmul.f32 -1.442695, %v2785_v22 }
 0x83c   :  { %4647 = vpow2.f32 %v3918_v46 }
 0x83d   :  { %4649 = vtanh.f32 %v2785_v22 }
 0x846   :  { %v4648_v51 = vpop.eup %4647 }
 0x847   :  { %v2792_v55 = vadd.f32 1.0, %v4648_v51  ;;  %v4650_v58 = vpop.eup %4649 }
 0x849   :  { %4651 = vrcp.f32 %v2792_v55 }
 0x84a   :  { %4653 = vpow2.f32 %v3919_v19 }
 0x853   :  { %v4652_v14 = vpop.eup %4651 }
 0x854   :  { %v2800_v18 = vmul.f32 %v4652_v14, %v4650_v58  ;;  %v4654_v44 = vpop.eup %4653  ;;  %v2799_v26 = vmul.f32 %v4652_v14, %v2687_v32 }
 0x855   :  { %v2793_v21 = vadd.f32 1.0, %v4654_v44 }
 0x856   :  { %2802 = vrot.lane.b32.xlu0 %v2800_v18, %s4762_s0 }
 0x857   :  { %4655 = vrcp.f32 %v2793_v21 }
 0x861   :  { %v4656_v1 = vpop.eup %4655 }
 0x8c8   :  { %v2803_v35 = vpop.permute.xlu0 %2802 }
 0x8c9   :  { %v2805_v30 = vadd.f32 %v2803_v35, %v2799_v26 }
 0x8cb   :  { %4657 = vtanh.f32 %v2805_v30 }
 0x8d5   :  { %v4658_v17 = vpop.eup %4657 }
 0x8d6   :  { %v2807_v31 = vmul.f32 %v4658_v17, %v4656_v1 }
 0x8d8   :  { %2811 = vrot.lane.b32.xlu1 %v2807_v31, %s4762_s0 }
 0x94a   :  { %v5126_v52 = vpop.permute.xlu1 %2811 }
 0x94b   :  { %3920 = vmatmul.mubr.msk.f32.vlgmr.msra.gmra.mrb[12].mxu1 %vm2357_vm3, %v5126_v52 }
 0x94c   :  { %4046 = vmatpush1.bf16.msra.mxu1 %v4850_v49  ;;  %2981 = vmatprep.mubr.f32.mxu1 %v4761_v12 }
 0x94d   :  { %4048 = vmatprep.subr.bf16.mxu1 %v4853_v53 }
 0x950   :  { %4050 = vmatpush1.bf16.msra.mxu1 %v4856_v57 }
 0x951   :  { %4052 = vmatprep.subr.bf16.mxu1 %v4865_v63 }
 0x954   :  { %4054 = vmatpush1.bf16.msra.mxu1 %v4868_v3 }
 0x955   :  { %4056 = vmatprep.subr.bf16.mxu1 %v4870_v8 }
 0x958   :  { %4058 = vmatpush1.bf16.msra.mxu1 %v4873_v11 }
 0x959   :  { %4060 = vmatprep.subr.bf16.mxu1 %v4847_v45 }
 0xa1e   :  { %v2881_v32 = vpop.f32.mrb[12].mxu1 }
 0xa1f   :  { %v2886_v33 = vadd.f32 %v2881_v32, %v2808_v61  ;;  %v2883_v23 = vpop.f32.mrb[13].mxu1 }
 0xa20   :  { %v2887_v25 = vadd.f32 %v2883_v23, %v2809_v2 }
 0xa21   :  { %v3921_v39 = vmul.f32 -1.442695, %v2886_v33 }
 0xa22   :  { %v3922_v54 = vmul.f32 -1.442695, %v2887_v25 }
 0xa23   :  { %4659 = vpow2.f32 %v3921_v39 }
 0xa24   :  { %4661 = vtanh.f32 %v2887_v25 }
 0xa2d   :  { %v4660_v37 = vpop.eup %4659 }
 0xa2e   :  { %v2894_v22 = vadd.f32 1.0, %v4660_v37  ;;  %v4662_v46 = vpop.eup %4661 }
 0xa30   :  { %4663 = vrcp.f32 %v2894_v22 }
 0xa31   :  { %4665 = vpow2.f32 %v3922_v54 }
 0xa3a   :  { %v4664_v51 = vpop.eup %4663 }
 0xa3b   :  { %v2902_v55 = vmul.f32 %v4664_v51, %v4662_v46  ;;  %v4666_v42 = vpop.eup %4665  ;;  %v2901_v58 = vmul.f32 %v4664_v51, %v2805_v30 }
 0xa3c   :  { %v2895_v61 = vadd.f32 1.0, %v4666_v42 }
 0xa3d   :  { %2904 = vrot.lane.b32.xlu0 %v2902_v55, %s4762_s0 }
 0xa3e   :  { %4667 = vrcp.f32 %v2895_v61 }
 0xa48   :  { %v4668_v59 = vpop.eup %4667 }
 0xaaf   :  { %v2905_v14 = vpop.permute.xlu0 %2904 }
 0xab0   :  { %v2907_v18 = vadd.f32 %v2905_v14, %v2901_v58 }
 0xab2   :  { %4669 = vtanh.f32 %v2907_v18 }
 0xabc   :  { %v4670_v56 = vpop.eup %4669 }
 0xabd   :  { %v2909_v2 = vmul.f32 %v4670_v56, %v4668_v59 }
 0xabf   :  { %2913 = vrot.lane.b32.xlu1 %v2909_v2, %s4762_s0 }
 0xb31   :  { %v5151_v19 = vpop.permute.xlu1 %2913 }
 0xb32   :  { %3923 = vmatmul.mubr.msk.f32.vlgmr.msra.gmra.mrb[14].mxu1 %vm2357_vm3, %v5151_v19 }
 0xb33   :  { %4062 = vmatpush1.bf16.msra.mxu1 %v4850_v49  ;;  %3083 = vmatprep.mubr.f32.mxu1 %v4761_v12 }
 0xb34   :  { %4064 = vmatprep.subr.bf16.mxu1 %v4853_v53 }
 0xb37   :  { %4066 = vmatpush1.bf16.msra.mxu1 %v4856_v57 }
 0xb38   :  { %4068 = vmatprep.subr.bf16.mxu1 %v4865_v63 }
 0xb3b   :  { %4070 = vmatpush1.bf16.msra.mxu1 %v4868_v3 }
 0xb3c   :  { %4072 = vmatprep.subr.bf16.mxu1 %v4870_v8 }
 0xb3f   :  { %4074 = vmatpush1.bf16.msra.mxu1 %v4873_v11 }
 0xb40   :  { %4076 = vmatprep.subr.bf16.mxu1 %v4847_v45 }
 0xc05   :  { %v2983_v44 = vpop.f32.mrb[14].mxu1 }
 0xc06   :  { %v2988_v21 = vadd.f32 %v2983_v44, %v2910_v50  ;;  %v2985_v26 = vpop.f32.mrb[15].mxu1 }
 0xc07   :  { %v2989_v35 = vadd.f32 %v2985_v26, %v2911_v60 }
 0xc08   :  { %v3924_v30 = vmul.f32 -1.442695, %v2988_v21 }
 0xc09   :  { %v3925_v24 = vmul.f32 -1.442695, %v2989_v35 }
 0xc0a   :  { %4671 = vpow2.f32 %v3924_v30  ;;  %v63_v30 = vld [vmem:[#allocation4 + $0x70] sm:$0xff] }
 0xc0b   :  { %4673 = vtanh.f32 %v2989_v35  ;;  %v62_v35 = vld [vmem:[#allocation4 + $0x58] sm:$0xff] }
 0xc14   :  { %v4672_v1 = vpop.eup %4671 }
 0xc15   :  { %v2996_v17 = vadd.f32 1.0, %v4672_v1  ;;  %v4674_v45 = vpop.eup %4673  ;;  %v64_v1 = vld [vmem:[#allocation4 + $0x88] sm:$0xff] }
 0xc17   :  { %4675 = vrcp.f32 %v2996_v17 }
 0xc18   :  { %4677 = vpow2.f32 %v3925_v24 }
 0xc21   :  { %v4676_v31 = vpop.eup %4675 }
 0xc22   :  { %v3004_v32 = vmul.f32 %v4676_v31, %v4674_v45  ;;  %v4678_v34 = vpop.eup %4677  ;;  %v3003_v33 = vmul.f32 %v4676_v31, %v2907_v18  ;;  %v4095_v45 = vpack.c.bf16 %v63_v30, %v62_v35  ;;  %v65_v31 = vld [vmem:[#allocation4 + $0xa0] sm:$0xff] }
 0xc23   :  { %v2997_v50 = vadd.f32 1.0, %v4678_v34  ;;  %v4099_v24 = vpack.c.bf16 %v65_v31, %v64_v1  ;;  %v66_v34 = vld [vmem:[#allocation4 + $0xb8] sm:$0xff] }
 0xc24   :  { %3006 = vrot.lane.b32.xlu0 %v3004_v32, %s4762_s0 }
 0xc25   :  { %4679 = vrcp.f32 %v2997_v50  ;;  %v67_v50 = vld [vmem:[#allocation4 + $0xd0] sm:$0xff] }
 0xc2f   :  { %v4680_v36 = vpop.eup %4679 }
 0xc96   :  { %v3007_v23 = vpop.permute.xlu0 %3006 }
 0xc97   :  { %v3009_v25 = vadd.f32 %v3007_v23, %v3003_v33  ;;  %v4103_v23 = vpack.c.bf16 %v67_v50, %v66_v34 }
 0xc99   :  { %4681 = vtanh.f32 %v3009_v25 }
 0xca3   :  { %v4682_v41 = vpop.eup %4681 }
 0xca4   :  { %v3011_v60 = vmul.f32 %v4682_v41, %v4680_v36 }
 0xca6   :  { %3015 = vrot.lane.b32.xlu1 %v3011_v60, %s4762_s0 }
 0xd18   :  { %v5176_v39 = vpop.permute.xlu1 %3015 }
 0xd19   :  { %3926 = vmatmul.mubr.msk.f32.vlgmr.msra.gmra.mrb[16].mxu1 %vm2357_vm3, %v5176_v39 }
 0xd1a   :  { %4078 = vmatpush1.bf16.msra.mxu1 %v4850_v49  ;;  %3185 = vmatprep.mubr.f32.mxu1 %v4761_v12 }
 0xd1b   :  { %4080 = vmatprep.subr.bf16.mxu1 %v4853_v53 }
 0xd1e   :  { %4082 = vmatpush1.bf16.msra.mxu1 %v4856_v57 }
 0xd1f   :  { %4084 = vmatprep.subr.bf16.mxu1 %v4865_v63 }
 0xd22   :  { %4086 = vmatpush1.bf16.msra.mxu1 %v4868_v3 }
 0xd23   :  { %4088 = vmatprep.subr.bf16.mxu1 %v4870_v8 }
 0xd26   :  { %4090 = vmatpush1.bf16.msra.mxu1 %v4873_v11 }
 0xdec   :  { %v3085_v37 = vpop.f32.mrb[16].mxu1 }
 0xded   :  { %v3090_v49 = vadd.f32 %v3085_v37, %v3012_v62  ;;  %v3087_v12 = vpop.f32.mrb[17].mxu1  ;;  %v3232_v37 = vsel %vm2331_vm4, %v5126_v52, %v5151_v19 }
 0xdee   :  { %v3091_v53 = vadd.f32 %v3087_v12, %v3013_v4 }
 0xdef   :  { %v3927_v57 = vmul.f32 -1.442695, %v3090_v49  ;;  %v3233_v49 = vsel %vm2331_vm4, %v5151_v19, %v5126_v52 }
 0xdf0   :  { %v3928_v0 = vmul.f32 -1.442695, %v3091_v53 }
 0xdf1   :  { %4683 = vpow2.f32 %v3927_v57  ;;  %v3229_v57 = vsel %vm2331_vm4, %v5101_v38, %v5176_v39 }
 0xdf2   :  { %4685 = vtanh.f32 %v3091_v53 }
 0xdfb   :  { %v4684_v63 = vpop.eup %4683 }
 0xdfc   :  { %v3098_v3 = vadd.f32 1.0, %v4684_v63  ;;  %v4686_v8 = vpop.eup %4685  ;;  %v3234_v63 = vsel %vm2331_vm4, %v5176_v39, %v5101_v38 }
 0xdfe   :  { %4687 = vrcp.f32 %v3098_v3 }
 0xdff   :  { %4689 = vpow2.f32 %v3928_v0 }
 0xe08   :  { %v4688_v11 = vpop.eup %4687 }
 0xe09   :  { %v3106_v22 = vmul.f32 %v4688_v11, %v4686_v8  ;;  %v4690_v10 = vpop.eup %4689  ;;  %v3105_v46 = vmul.f32 %v4688_v11, %v3009_v25  ;;  %v4763_v25 = vmov 1966171168  }
 0xe0a   :  { %v3099_v62 = vadd.f32 1.0, %v4690_v10  ;;  %v3239_v36 = vunpack.c.l.s4 %v4763_v25 }
 0xe0b   :  { %3108 = vrot.lane.b32.xlu0 %v3106_v22, %s4762_s0 }
 0xe0c   :  { %4691 = vrcp.f32 %v3099_v62  ;;  %v3240_v41 = vunpack.c.0.s8 %v3239_v36 }
 0xe0e   :  { %v5218_v60 = vsub.s32 %v3240_v41, %v4898_v27 }
 0xe10   :  { %v3315_v12 = vrot.slane %v3232_v37, %v5218_v60  ;;  %v3338_v53 = vrot.slane %v3233_v49, %v5218_v60  ;;  %v3292_v8 = vrot.slane %v3229_v57, %v5218_v60  ;;  %v3361_v11 = vrot.slane %v3234_v63, %v5218_v60  ;;  %v59_v63 = vld [vmem:[#allocation4 + $0x10] ss:$0 sm:$0xff] }
 0xe12   :  { %v3316_v52 = vcombine.high %v3315_v12, %v3315_v12  ;;  %v3339_v19 = vcombine.high %v3338_v53, %v3338_v53  ;;  %v3323_v22 = vrot.slane %v3315_v12, %v5218_v60  ;;  %v3346_v10 = vrot.slane %v3338_v53, %v5218_v60 }
 0xe14   :  { %v3330_v0 = vrot.slane %v3316_v52, %v5218_v60  ;;  %v3353_v62 = vrot.slane %v3339_v19, %v5218_v60 }
 0xe16   :  { %v4692_v5 = vpop.eup %4691 }
 0xe7d   :  { %v3109_v51 = vpop.permute.xlu0 %3108 }
 0xe7e   :  { %v3111_v55 = vadd.f32 %v3109_v51, %v3105_v46  ;;  %v3293_v46 = vcombine.high %v3292_v8, %v3292_v8  ;;  %v3362_v51 = vcombine.high %v3361_v11, %v3361_v11 }
 0xe80   :  { %4693 = vtanh.f32 %v3111_v55 }
 0xe8a   :  { %v4694_v20 = vpop.eup %4693 }
 0xe8b   :  { %v3113_v4 = vmul.f32 %v4694_v20, %v4692_v5 }
 0xe8d   :  { %3117 = vrot.lane.b32.xlu1 %v3113_v4, %s4762_s0  ;;  %v3446_v4 = vrot.slane %v3323_v22, %v4903_v29 }
 0xeff   :  { %v5200_v54 = vpop.permute.xlu1 %3117 }
 0xf00   :  { %3929 = vmatmul.mubr.msk.f32.vlgmr.msra.gmra.mrb[18].mxu1 %vm2357_vm3, %v5200_v54  ;;  %v3226_v27 = vsel %vm2331_vm4, %v5076_v40, %v5200_v54  ;;  %v3235_v38 = vsel %vm2331_vm4, %v5200_v54, %v5076_v40  ;;  %v3369_v40 = vrot.slane %v3361_v11, %v5218_v60 }
 0xf01   :  { %v3269_v3 = vrot.slane %v3226_v27, %v5218_v60  ;;  %v3384_v20 = vrot.slane %v3235_v38, %v5218_v60 }
 0xf03   :  { %v3270_v39 = vcombine.high %v3269_v3, %v3269_v3  ;;  %v3277_v5 = vrot.slane %v3269_v3, %v5218_v60 }
 0xf05   :  { %v3284_v54 = vrot.slane %v3270_v39, %v5218_v60 }
 0xfd3   :  { %v3187_v42 = vpop.f32.mrb[18].mxu1 }
 0xfd4   :  { %v3192_v61 = vadd.f32 %v3187_v42, %v3114_v6  ;;  %v3189_v58 = vpop.f32.mrb[19].mxu1  ;;  %v4091_v6 = vpack.c.bf16 %v61_v9, %v60_v7  ;;  %v3450_v42 = vrot.slane %v3330_v0, %v4903_v29  ;;  %v3385_v9 = vcombine.high %v3384_v20, %v3384_v20 }
 0xfd5   :  { %v3193_v14 = vadd.f32 %v3189_v58, %v3115_v13  ;;  %v3460_v58 = vrot.slane %v3353_v62, %v4903_v29 }
 0xfd6   :  { %v3930_v18 = vmul.f32 -1.442695, %v3192_v61  ;;  %4092 = vmatprep.subr.bf16.mxu1 %v4091_v6  ;;  %v3456_v61 = vrot.slane %v3346_v10, %v4903_v29  ;;  %v3399_v1 = vrot.slane %v3385_v9, %v5218_v60 }
 0xfd7   :  { %4094 = vmatpush3.bf16.msra.mxu1 %v4091_v6  ;;  %v3931_v48 = vmul.f32 -1.442695, %v3193_v14  ;;  %v3426_v6 = vrot.slane %v3277_v5, %v4903_v29 }
 0xfd8   :  { %4695 = vpow2.f32 %v3930_v18  ;;  %4096 = vmatprep.subr.bf16.mxu1 %v4095_v45  ;;  %v3480_v41 = vrot.slane %v3399_v1, %v4903_v29 }
 0xfd9   :  { %4697 = vtanh.f32 %v3193_v14 }
 0xfdb   :  { %4098 = vmatpush3.bf16.msra.mxu1 %v4095_v45 }
 0xfdc   :  { %4100 = vmatprep.subr.bf16.mxu1 %v4099_v24 }
 0xfdf   :  { %4102 = vmatpush3.bf16.msra.mxu1 %v4099_v24 }
 0xfe0   :  { %4104 = vmatprep.subr.bf16.mxu1 %v4103_v23 }
 0xfe2   :  { %v4696_v59 = vpop.eup %4695 }
 0xfe3   :  { %v3200_v56 = vadd.f32 1.0, %v4696_v59  ;;  %v4698_v2 = vpop.eup %4697  ;;  %4106 = vmatpush3.bf16.msra.mxu1 %v4103_v23 }
 0xfe5   :  { %4699 = vrcp.f32 %v3200_v56  ;;  %v3307_v56 = vrot.slane %v3293_v46, %v5218_v60 }
 0xfe6   :  { %4701 = vpow2.f32 %v3931_v48 }
 0xfe7   :  { %v3440_v30 = vrot.slane %v3307_v56, %v4903_v29 }
 0xfef   :  { %v4700_v44 = vpop.eup %4699 }
 0xff0   :  { %v3208_v47 = vmul.f32 %v4700_v44, %v4698_v2  ;;  %v4702_v15 = vpop.eup %4701  ;;  %v3207_v13 = vmul.f32 %v4700_v44, %v3111_v55  ;;  %v3300_v55 = vrot.slane %v3292_v8, %v5218_v60  ;;  %v3376_v2 = vrot.slane %v3362_v51, %v5218_v60 }
 0xff1   :  { %v3201_v16 = vadd.f32 1.0, %v4702_v15 }
 0xff2   :  { %3210 = vrot.lane.b32.xlu0 %v3208_v47, %s4762_s0  ;;  %v3436_v7 = vrot.slane %v3300_v55, %v4903_v29 }
 0xff3   :  { %4703 = vrcp.f32 %v3201_v16  ;;  %v3392_v16 = vrot.slane %v3384_v20, %v5218_v60 }
 0xff5   :  { %v3476_v24 = vrot.slane %v3392_v16, %v4903_v29 }
 0xffd   :  { %v4704_v17 = vpop.eup %4703 }
0x1064   :  { %v3211_v21 = vpop.permute.xlu0 %3210 }
0x1065   :  { %v3213_v26 = vadd.f32 %v3211_v21, %v3207_v13  ;;  %v3430_v13 = vrot.slane %v3284_v54, %v4903_v29 }
0x1067   :  { %4705 = vtanh.f32 %v3213_v26 }
0x1071   :  { %v4706_v32 = vpop.eup %4705 }
0x1072   :  { %v3215_v33 = vmul.f32 %v4706_v32, %v4704_v17 }
0x1074   :  { %3220 = vrot.lane.b32.xlu1 %v3215_v33, %s4762_s0  ;;  %v3470_v33 = vrot.slane %v3376_v2, %v4903_v29 }
0x10e6   :  { %v3221_v14 = vpop.permute.xlu1 %3220 }
0x10e7   :  { %v3223_v18 = vsel %vm2331_vm4, %v5051_v43, %v3221_v14  ;;  %v3236_v59 = vsel %vm2331_vm4, %v3221_v14, %v5051_v43  ;;  %v3466_v43 = vrot.slane %v3369_v40, %v4903_v29 }
0x10e8   :  { %v3244_v44 = vrot.slane %v3223_v18, %v5218_v60  ;;  %v3407_v47 = vrot.slane %v3236_v59, %v5218_v60 }
0x10ea   :  { %v3245_v48 = vcombine.high %v3244_v44, %v3244_v44  ;;  %v3252_v15 = vrot.slane %v3244_v44, %v5218_v60  ;;  %v3408_v28 = vcombine.high %v3407_v47, %v3407_v47  ;;  %v3415_v26 = vrot.slane %v3407_v47, %v5218_v60 }
0x10ec   :  { %v3259_v21 = vrot.slane %v3245_v48, %v5218_v60  ;;  %v3494_v35 = vsel %vm3493_vm5, %v3252_v15, %v3426_v6  ;;  %v3422_v45 = vrot.slane %v3408_v28, %v5218_v60  ;;  %v3486_v23 = vrot.slane %v3415_v26, %v4903_v29 }
0x10ed   :  { %v3497_v17 = vsel %vm3496_vm6, %v3494_v35, %v3436_v7 }
0x10ee   :  { %v3495_v31 = vsel %vm3493_vm5, %v3259_v21, %v3430_v13  ;;  %v3500_v32 = vsel %vm3499_vm7, %v3497_v17, %v3446_v4  ;;  %v3490_v49 = vrot.slane %v3422_v45, %v4903_v29 }
0x10ef   :  { %v3498_v34 = vsel %vm3496_vm6, %v3495_v31, %v3440_v30  ;;  %v3503_v50 = vsel %vm3502_vm8, %v3500_v32, %v3456_v61 }
0x10f0   :  { %v3506_v25 = vsel %vm3505_vm9, %v3503_v50, %v3466_v43  ;;  %v3501_v36 = vsel %vm3499_vm7, %v3498_v34, %v3450_v42 }
0x10f1   :  { %v3509_v60 = vsel %vm3508_vm10, %v3506_v25, %v3476_v24  ;;  %v3504_v37 = vsel %vm3502_vm8, %v3501_v36, %v3460_v58 }
0x10f2   :  { %v3512_v12 = vsel %vm3511_vm11, %v3509_v60, %v3486_v23  ;;  %v3507_v53 = vsel %vm3505_vm9, %v3504_v37, %v3470_v33 }
0x10f3   :  { %3960 = vmatprep.mubr.msk.f32.mxu1 %vm2357_vm3, %v3512_v12  ;;  %v3510_v27 = vsel %vm3508_vm10, %v3507_v53, %v3480_v41 }
0x10f4   :  { %v3513_v57 = vsel %vm3511_vm11, %v3510_v27, %v3490_v49 }
0x10f5   :  { %3961 = vmatmul.mubr.msk.f32.vlgmr.msra.gmra.mrb[20].mxu1 %vm2357_vm3, %v3513_v57 }
0x11c8   :  { %v3962_v52 = vpop.f32.mrb[20].mxu1 }
0x11c9   :  { %v3592_v19 = vadd.f32 %v3962_v52, %v59_v63  ;;  %v3586_v3 = vpop.f32.mrb[21].mxu1 }
0x11ca   :  { %v3587_v8 = vadd.f32 %v3586_v3, %v59_v63 }
0x11cb   :  { %3596 = vst [vmem:[%s5311_s3 + $0x8] sm:$0xff] %v3592_v19 }
0x11cc   :  { %3595 = vst [vmem:[%s5311_s3] sm:$0xff] %v3587_v8 }
0x11cd   :  { %3601 = vsyncpa [#allocation3], 1 }
0x11ce   :  { %3602 = vsyncpa [#allocation5], 1 }

</bundles_post_ra>
